<compile_context>
chip_gen: v6e
topology: v6e:2x2x1
jax: 0.10.0
libtpu: 0.0.40
codegen_flags: <defaults>
</compile_context>

<pallas_src>
import functools

import jax
import jax.numpy as jnp
import numpy as np
from jax.experimental import pallas as pl
from jax.experimental.pallas import tpu as pltpu

_NEG_BIG = -1e30                     # bias for padded output lanes -> excluded from log_softmax
_LANE = 128
_NODE_PAD = 256                      # N padding granularity (decoupled from tile size)
_FUSED_VMEM_BUDGET = 24 * 1024 * 1024     # fused single-call path, safe on v5e/v6e/v7x
_RESIDENT_VMEM_BUDGET = 16 * 1024 * 1024  # resident XW1/HW2 slab incl. double buffer (v7x-safe)
_VMEM_LIMIT_CAP = 48 * 1024 * 1024        # never request more scoped VMEM than this


def _round_up(x, m):
    return ((x + m - 1) // m) * m


def _padded_nodes(num_nodes):
    return _round_up(max(num_nodes, _NODE_PAD), _NODE_PAD)


def _clamp_vmem_limit(need_bytes):
    return int(min(_VMEM_LIMIT_CAP, max(int(need_bytes), 16 * 1024 * 1024)))


def _choose_tiles(n_pad):
    """Row tile tm (>=2 blocks, prefer an even block count for v7x megacore) and
    reduction tile tk (largest divisor of n_pad, up to 1024)."""
    cands = (1024, 512, 256)
    best_even = None
    best_any = None
    for t in cands:
        if n_pad % t:
            continue
        cnt = n_pad // t
        if cnt >= 2:
            if best_any is None:
                best_any = t
            if cnt % 2 == 0 and best_even is None:
                best_even = t
    tm = best_even or best_any or 256
    tk = next((t for t in cands if n_pad % t == 0), 256)
    return tm, tk


def _fused_vmem_bytes(n_pad, f_pad, h_pad, c_pad):
    ins = (n_pad * n_pad * 2 + n_pad * f_pad * 2 + f_pad * h_pad * 2
           + h_pad * 4 + h_pad * c_pad * 2 + c_pad * 4)
    out = n_pad * c_pad * 4
    # f32 intermediates (xw1, h, hw2, z) + bf16 copies fed to the MXU
    tmp = (2 * n_pad * h_pad * 4 + 2 * n_pad * c_pad * 4
           + n_pad * h_pad * 2 + n_pad * c_pad * 2)
    return ins + out + tmp


# ---------------------------------------------------------------------------
# Fused small-graph kernel: the whole forward in one VMEM-resident pallas_call.
# ---------------------------------------------------------------------------
def _fused_kernel(a_ref, x_ref, w1_ref, b1_ref, w2_ref, b2_ref, o_ref):
    xw1 = jnp.dot(x_ref[...], w1_ref[...], preferred_element_type=jnp.float32)
    h = jnp.dot(a_ref[...], xw1.astype(jnp.bfloat16),
                preferred_element_type=jnp.float32)
    h = jnp.maximum(h + b1_ref[...], 0.0)
    # TODO(synk): F.dropout(training=True) would mask h via pltpu.prng_seed +
    # pltpu.prng_random_bits; eval mode (training=False) is the identity.
    hw2 = jnp.dot(h.astype(jnp.bfloat16), w2_ref[...],
                  preferred_element_type=jnp.float32)
    z = jnp.dot(a_ref[...], hw2.astype(jnp.bfloat16),
                preferred_element_type=jnp.float32) + b2_ref[...]
    m = jnp.max(z, axis=1, keepdims=True)
    s = z - m
    lse = jnp.log(jnp.sum(jnp.exp(s), axis=1, keepdims=True))
    o_ref[...] = s - lse


# ---------------------------------------------------------------------------
# Kernel 1: feature transform  XW = X @ W   (row-tiled, W fully resident)
# ---------------------------------------------------------------------------
def _transform_kernel(x_ref, w_ref, o_ref):
    o_ref[...] = jnp.dot(x_ref[...], w_ref[...],
                         preferred_element_type=jnp.float32).astype(o_ref.dtype)


def _transform(x, w, tm):
    n_pad, f_pad = x.shape
    h_pad = w.shape[1]
    need = 2 * tm * f_pad * 2 + 2 * f_pad * h_pad * 2 + 2 * tm * h_pad * 2
    return pl.pallas_call(
        _transform_kernel,
        out_shape=jax.ShapeDtypeStruct((n_pad, h_pad), jnp.bfloat16),
        grid_spec=pltpu.PrefetchScalarGridSpec(
            num_scalar_prefetch=0,
            grid=(n_pad // tm,),
            in_specs=[pl.BlockSpec((tm, f_pad), lambda i: (i, 0)),
                      pl.BlockSpec((f_pad, h_pad), lambda i: (0, 0))],
            out_specs=pl.BlockSpec((tm, h_pad), lambda i: (i, 0))),
        compiler_params=pltpu.CompilerParams(
            dimension_semantics=("parallel",),
            vmem_limit_bytes=_clamp_vmem_limit(2 * need)),
        cost_estimate=pl.CostEstimate(
            flops=2 * n_pad * f_pad * h_pad,
            transcendentals=0,
            bytes_accessed=2 * (n_pad * f_pad + f_pad * h_pad + n_pad * h_pad)),
    )(x, w)


# ---------------------------------------------------------------------------
# Kernel 2: layer-1 aggregation + bias + ReLU, fused with the layer-2 transform.
#   acc[i] = sum_k A[i,k] @ XW1[k]   ->   HW2[i] = relu(acc + b1) @ W2
# `resident=True`: XW1 lives whole in VMEM (constant index_map) and is sliced in-kernel.
# ---------------------------------------------------------------------------
def _make_agg1_kernel(tk, resident):
    def kernel(a_ref, xw_ref, b1_ref, w2_ref, o_ref, acc_ref):
        k = pl.program_id(1)

        @pl.when(k == 0)
        def _():
            acc_ref[...] = jnp.zeros_like(acc_ref)

        if resident:
            xw = xw_ref[pl.ds(pl.multiple_of(k * tk, tk), tk), :]
        else:
            xw = xw_ref[...]
        acc_ref[...] += jnp.dot(a_ref[...], xw, preferred_element_type=jnp.float32)

        @pl.when(k == pl.num_programs(1) - 1)
        def _():
            h = jnp.maximum(acc_ref[...] + b1_ref[...], 0.0)
            # TODO(synk): training-mode dropout would mask h here; eval mode is identity.
            o_ref[...] = jnp.dot(h.astype(w2_ref.dtype), w2_ref[...],
                                 preferred_element_type=jnp.float32).astype(o_ref.dtype)

    return kernel


# ---------------------------------------------------------------------------
# Kernel 3: layer-2 aggregation + bias + log_softmax over the feature axis.
# ---------------------------------------------------------------------------
def _make_agg2_kernel(tk, resident):
    def kernel(a_ref, hw_ref, b2_ref, o_ref, acc_ref):
        k = pl.program_id(1)

        @pl.when(k == 0)
        def _():
            acc_ref[...] = jnp.zeros_like(acc_ref)

        if resident:
            hw = hw_ref[pl.ds(pl.multiple_of(k * tk, tk), tk), :]
        else:
            hw = hw_ref[...]
        acc_ref[...] += jnp.dot(a_ref[...], hw, preferred_element_type=jnp.float32)

        @pl.when(k == pl.num_programs(1) - 1)
        def _():
            z = acc_ref[...] + b2_ref[...]        # padded lanes get -1e30 -> ignored
            m = jnp.max(z, axis=1, keepdims=True)
            s = z - m
            lse = jnp.log(jnp.sum(jnp.exp(s), axis=1, keepdims=True))
            o_ref[...] = s - lse

    return kernel


# ---------------------------------------------------------------------------
# Plain-JAX glue: dense normalized adjacency, built once at padded size (bf16).
# ---------------------------------------------------------------------------
def build_normalized_adjacency(edge_index, num_nodes, n_pad):
    # Duplicate edges scatter-ADD (PyG GCNConv parity).
    src = edge_index[0]
    dst = edge_index[1]
    loop = jnp.arange(num_nodes, dtype=edge_index.dtype)
    src = jnp.concatenate([src, loop])
    dst = jnp.concatenate([dst, loop])
    adj = jnp.zeros((n_pad, n_pad), jnp.float32).at[dst, src].add(1.0)
    deg = jnp.sum(adj, axis=1)
    dinv = jnp.where(deg > 0, 1.0 / jnp.sqrt(deg), 0.0)
    return (dinv[:, None] * adj * dinv[None, :]).astype(jnp.bfloat16)


def gcn_apply(a_hat, x, w1, b1, w2, b2, num_nodes,
              fused_vmem_budget=_FUSED_VMEM_BUDGET):
    """a_hat: bf16 [n_pad, n_pad]; x: [num_nodes, F]. Returns [num_nodes, out_channels]."""
    n = num_nodes
    f_in = x.shape[1]
    hidden = w1.shape[1]
    c_out = w2.shape[1]

    n_pad = a_hat.shape[0]
    f_pad = _round_up(f_in, _LANE)
    h_pad = _round_up(hidden, _LANE)
    c_pad = _round_up(c_out, _LANE)

    # --- lane-dense padding of activations / parameters (bf16 operands, f32 biases) ---
    x_p = jnp.zeros((n_pad, f_pad), jnp.bfloat16).at[:n, :f_in].set(
        x.astype(jnp.bfloat16))
    w1_p = jnp.zeros((f_pad, h_pad), jnp.bfloat16).at[:f_in, :hidden].set(
        w1.astype(jnp.bfloat16))
    b1_p = jnp.zeros((1, h_pad), jnp.float32).at[0, :hidden].set(
        b1.astype(jnp.float32))
    w2_p = jnp.zeros((h_pad, c_pad), jnp.bfloat16).at[:hidden, :c_out].set(
        w2.astype(jnp.bfloat16))
    b2_p = jnp.full((1, c_pad), _NEG_BIG, jnp.float32).at[0, :c_out].set(
        b2.astype(jnp.float32))

    # --- small-graph fast path: one fused, fully VMEM-resident kernel ---
    fused_bytes = _fused_vmem_bytes(n_pad, f_pad, h_pad, c_pad)
    if fused_bytes <= fused_vmem_budget:
        out = pl.pallas_call(
            _fused_kernel,
            out_shape=jax.ShapeDtypeStruct((n_pad, c_pad), jnp.float32),
            compiler_params=pltpu.CompilerParams(
                vmem_limit_bytes=_clamp_vmem_limit(int(1.5 * fused_bytes))),
            cost_estimate=pl.CostEstimate(
                flops=2 * n_pad * (f_pad * h_pad + n_pad * h_pad
                                   + h_pad * c_pad + n_pad * c_pad),
                transcendentals=n_pad * c_pad,
                bytes_accessed=fused_bytes),
        )(a_hat, x_p, w1_p, b1_p, w2_p, b2_p)
        return out[:n, :c_out]

    # --- large-graph tiled path ---
    tm, tk = _choose_tiles(n_pad)

    # K1: XW1 = X @ W1 (hoisted out of the A-tiled reduction loop)
    xw1 = _transform(x_p, w1_p, tm)

    grid = (n_pad // tm, n_pad // tk)
    a_spec = pl.BlockSpec((tm, tk), lambda i, k: (i, k))

    # Keep XW1/HW2 fully VMEM-resident (no per-row-tile re-stream) when they fit.
    resident = 2 * n_pad * h_pad * 2 <= _RESIDENT_VMEM_BUDGET
    if resident:
        xw_spec = pl.BlockSpec((n_pad, h_pad), lambda i, k: (0, 0))
        hw_spec = pl.BlockSpec((n_pad, c_pad), lambda i, k: (0, 0))
        xw_stream_bytes = n_pad * h_pad * 2
        hw_stream_bytes = n_pad * c_pad * 2
    else:
        xw_spec = pl.BlockSpec((tk, h_pad), lambda i, k: (k, 0))
        hw_spec = pl.BlockSpec((tk, c_pad), lambda i, k: (k, 0))
        xw_stream_bytes = (n_pad // tm) * n_pad * h_pad * 2   # re-streamed per row tile
        hw_stream_bytes = (n_pad // tm) * n_pad * c_pad * 2

    # --- K2: HW2 = relu(A_hat @ XW1 + b1) @ W2 ---
    k2_need = (2 * tm * tk * 2
               + (2 * n_pad * h_pad * 2 if resident else 2 * tk * h_pad * 2)
               + 2 * h_pad * 4 + 2 * h_pad * c_pad * 2
               + 2 * tm * c_pad * 2 + tm * h_pad * 4)
    hw2 = pl.pallas_call(
        _make_agg1_kernel(tk, resident),
        out_shape=jax.ShapeDtypeStruct((n_pad, c_pad), jnp.bfloat16),
        grid_spec=pltpu.PrefetchScalarGridSpec(
            num_scalar_prefetch=0,
            grid=grid,
            in_specs=[a_spec, xw_spec,
                      pl.BlockSpec((1, h_pad), lambda i, k: (0, 0)),
                      pl.BlockSpec((h_pad, c_pad), lambda i, k: (0, 0))],
            out_specs=pl.BlockSpec((tm, c_pad), lambda i, k: (i, 0)),
            scratch_shapes=[pltpu.VMEM((tm, h_pad), jnp.float32)]),
        compiler_params=pltpu.CompilerParams(
            dimension_semantics=("parallel", "arbitrary"),
            vmem_limit_bytes=_clamp_vmem_limit(int(1.4 * k2_need))),
        cost_estimate=pl.CostEstimate(
            flops=2 * n_pad * n_pad * h_pad + 2 * n_pad * h_pad * c_pad,
            transcendentals=0,
            bytes_accessed=(2 * n_pad * n_pad + xw_stream_bytes
                            + 2 * h_pad * c_pad + 2 * n_pad * c_pad)),
    )(a_hat, xw1, b1_p, w2_p)

    # --- K3: out = log_softmax(A_hat @ HW2 + b2) ---
    k3_need = (2 * tm * tk * 2
               + (2 * n_pad * c_pad * 2 if resident else 2 * tk * c_pad * 2)
               + 2 * c_pad * 4 + 2 * tm * c_pad * 4 + tm * c_pad * 4)
    out = pl.pallas_call(
        _make_agg2_kernel(tk, resident),
        out_shape=jax.ShapeDtypeStruct((n_pad, c_pad), jnp.float32),
        grid_spec=pltpu.PrefetchScalarGridSpec(
            num_scalar_prefetch=0,
            grid=grid,
            in_specs=[a_spec, hw_spec,
                      pl.BlockSpec((1, c_pad), lambda i, k: (0, 0))],
            out_specs=pl.BlockSpec((tm, c_pad), lambda i, k: (i, 0)),
            scratch_shapes=[pltpu.VMEM((tm, c_pad), jnp.float32)]),
        compiler_params=pltpu.CompilerParams(
            dimension_semantics=("parallel", "arbitrary"),
            vmem_limit_bytes=_clamp_vmem_limit(int(1.4 * k3_need))),
        cost_estimate=pl.CostEstimate(
            flops=2 * n_pad * n_pad * c_pad,
            transcendentals=n_pad * c_pad,
            bytes_accessed=(2 * n_pad * n_pad + hw_stream_bytes
                            + 4 * c_pad + 4 * n_pad * c_pad)),
    )(a_hat, hw2, b2_p)

    return out[:n, :c_out]


def gcn_forward(x, edge_index, w1, b1, w2, b2, **kw):
    n = x.shape[0]
    a_hat = build_normalized_adjacency(edge_index, n, _padded_nodes(n))
    return gcn_apply(a_hat, x, w1, b1, w2, b2, n, **kw)


# ---------------------------------------------------------------------------
# Pure-JAX f32 reference (same forward semantics, dense adjacency, no padding).
# ---------------------------------------------------------------------------
def gcn_reference(x, edge_index, w1, b1, w2, b2):
    n = x.shape[0]
    loop = jnp.arange(n, dtype=edge_index.dtype)
    src = jnp.concatenate([edge_index[0], loop])
    dst = jnp.concatenate([edge_index[1], loop])
    adj = jnp.zeros((n, n), jnp.float32).at[dst, src].add(1.0)
    deg = jnp.sum(adj, axis=1)
    dinv = jnp.where(deg > 0, 1.0 / jnp.sqrt(deg), 0.0)
    a_hat = dinv[:, None] * adj * dinv[None, :]
    h = a_hat @ (x @ w1) + b1[None, :]
    h = jnp.maximum(h, 0.0)
    z = a_hat @ (h @ w2) + b2[None, :]
    return jax.nn.log_softmax(z, axis=1)


if __name__ == "__main__":
    def make_problem(key, n_nodes, n_edges, f_in, hidden, c_out):
        k_x, k_e, k_w1, k_b1, k_w2, k_b2 = jax.random.split(key, 6)
        x = jax.random.normal(k_x, (n_nodes, f_in), jnp.float32)
        edge_index = jax.random.randint(k_e, (2, n_edges), 0, n_nodes, dtype=jnp.int32)
        w1 = jax.random.normal(k_w1, (f_in, hidden), jnp.float32) * 0.2
        b1 = jax.random.normal(k_b1, (hidden,), jnp.float32) * 0.1
        w2 = jax.random.normal(k_w2, (hidden, c_out), jnp.float32) * 0.2
        b2 = jax.random.normal(k_b2, (c_out,), jnp.float32) * 0.1
        return x, edge_index, w1, b1, w2, b2

    key = jax.random.PRNGKey(0)
    k_small, k_big = jax.random.split(key)

    # --- Test 1: small graph -> fused single-kernel fast path (demo size) ---
    n_nodes = 32
    x, ei, w1, b1, w2, b2 = make_problem(k_small, n_nodes, 64, 16, 32, 8)
    a_hat = jax.block_until_ready(
        build_normalized_adjacency(ei, n_nodes, _padded_nodes(n_nodes)))
    apply_small = jax.jit(functools.partial(gcn_apply, num_nodes=n_nodes))
    out = jax.block_until_ready(apply_small(a_hat, x, w1, b1, w2, b2))
    ref = jax.block_until_ready(gcn_reference(x, ei, w1, b1, w2, b2))
    np.testing.assert_allclose(np.asarray(out), np.asarray(ref), atol=5e-2, rtol=5e-2)

    # --- Test 2: larger graph with the fused path disabled -> tiled K1/K2/K3 pipeline
    # (exercises 512-row tiles, tk=1024 reduction, resident XW1/HW2, padding slice-out) ---
    n_nodes = 1000
    x, ei, w1, b1, w2, b2 = make_problem(k_big, n_nodes, 4000, 48, 64, 12)
    a_hat = jax.block_until_ready(
        build_normalized_adjacency(ei, n_nodes, _padded_nodes(n_nodes)))
    apply_big = jax.jit(functools.partial(gcn_apply, num_nodes=n_nodes,
                                          fused_vmem_budget=0))
    out = jax.block_until_ready(apply_big(a_hat, x, w1, b1, w2, b2))
    ref = jax.block_until_ready(gcn_reference(x, ei, w1, b1, w2, b2))
    # bf16 operands / intermediates (f32 accumulation) -> looser tolerance than pure f32.
    np.testing.assert_allclose(np.asarray(out), np.asarray(ref), atol=1e-1, rtol=1e-1)

    print("KERNEL_OK")
</pallas_src>

<mosaic_0001>
module attributes {stable_mosaic.version = 11 : i64} {
  func.func @_fused_kernel(%arg0: memref<256x256xbf16, #tpu.memory_space<vmem>>, %arg1: memref<256x128xbf16, #tpu.memory_space<vmem>>, %arg2: memref<128x128xbf16, #tpu.memory_space<vmem>>, %arg3: memref<1x128xf32, #tpu.memory_space<vmem>>, %arg4: memref<128x128xbf16, #tpu.memory_space<vmem>>, %arg5: memref<1x128xf32, #tpu.memory_space<vmem>>, %arg6: memref<256x128xf32, #tpu.memory_space<vmem>>) attributes {dimension_semantics = [], scalar_prefetch = 0 : i64, scratch_operands = 0 : i64, tpu.core_type = #tpu.core_type<tc>} {
    %c0 = arith.constant 0 : index
    %c0_0 = arith.constant 0 : index
    %0 = vector.load %arg1[%c0, %c0_0] : memref<256x128xbf16, #tpu.memory_space<vmem>>, vector<256x128xbf16>
    %c0_1 = arith.constant 0 : index
    %c0_2 = arith.constant 0 : index
    %1 = vector.load %arg2[%c0_1, %c0_2] : memref<128x128xbf16, #tpu.memory_space<vmem>>, vector<128x128xbf16>
    %cst = arith.constant dense<0.000000e+00> : vector<256x128xf32>
    %2 = tpu.matmul %0, %1, %cst {dimension_numbers = #tpu.dot_dimension_numbers<[1], [0], [0], [1], [0, 0, 1, 1], [], []>} : vector<256x128xbf16>, vector<128x128xbf16>, vector<256x128xf32> -> vector<256x128xf32>
    %c0_3 = arith.constant 0 : index
    %c0_4 = arith.constant 0 : index
    %3 = vector.load %arg0[%c0_3, %c0_4] : memref<256x256xbf16, #tpu.memory_space<vmem>>, vector<256x256xbf16>
    %4 = arith.truncf %2 : vector<256x128xf32> to vector<256x128xbf16>
    %cst_5 = arith.constant dense<0.000000e+00> : vector<256x128xf32>
    %5 = tpu.matmul %3, %4, %cst_5 {dimension_numbers = #tpu.dot_dimension_numbers<[1], [0], [0], [1], [0, 0, 1, 1], [], []>} : vector<256x256xbf16>, vector<256x128xbf16>, vector<256x128xf32> -> vector<256x128xf32>
    %c0_6 = arith.constant 0 : index
    %c0_7 = arith.constant 0 : index
    %6 = vector.load %arg3[%c0_6, %c0_7] : memref<1x128xf32, #tpu.memory_space<vmem>>, vector<1x128xf32>
    %7 = vector.broadcast %6 : vector<1x128xf32> to vector<256x128xf32>
    %8 = arith.addf %5, %7 : vector<256x128xf32>
    %cst_8 = arith.constant 0.000000e+00 : f32
    %9 = vector.broadcast %cst_8 : f32 to vector<256x128xf32>
    %10 = arith.maximumf %8, %9 : vector<256x128xf32>
    %11 = arith.truncf %10 : vector<256x128xf32> to vector<256x128xbf16>
    %c0_9 = arith.constant 0 : index
    %c0_10 = arith.constant 0 : index
    %12 = vector.load %arg4[%c0_9, %c0_10] : memref<128x128xbf16, #tpu.memory_space<vmem>>, vector<128x128xbf16>
    %cst_11 = arith.constant dense<0.000000e+00> : vector<256x128xf32>
    %13 = tpu.matmul %11, %12, %cst_11 {dimension_numbers = #tpu.dot_dimension_numbers<[1], [0], [0], [1], [0, 0, 1, 1], [], []>} : vector<256x128xbf16>, vector<128x128xbf16>, vector<256x128xf32> -> vector<256x128xf32>
    %c0_12 = arith.constant 0 : index
    %c0_13 = arith.constant 0 : index
    %14 = vector.load %arg0[%c0_12, %c0_13] : memref<256x256xbf16, #tpu.memory_space<vmem>>, vector<256x256xbf16>
    %15 = arith.truncf %13 : vector<256x128xf32> to vector<256x128xbf16>
    %cst_14 = arith.constant dense<0.000000e+00> : vector<256x128xf32>
    %16 = tpu.matmul %14, %15, %cst_14 {dimension_numbers = #tpu.dot_dimension_numbers<[1], [0], [0], [1], [0, 0, 1, 1], [], []>} : vector<256x256xbf16>, vector<256x128xbf16>, vector<256x128xf32> -> vector<256x128xf32>
    %c0_15 = arith.constant 0 : index
    %c0_16 = arith.constant 0 : index
    %17 = vector.load %arg5[%c0_15, %c0_16] : memref<1x128xf32, #tpu.memory_space<vmem>>, vector<1x128xf32>
    %18 = vector.broadcast %17 : vector<1x128xf32> to vector<256x128xf32>
    %19 = arith.addf %16, %18 : vector<256x128xf32>
    %cst_17 = arith.constant dense<0xFF800000> : vector<256xf32>
    %20 = vector.multi_reduction <maximumf>, %19, %cst_17 [1] : vector<256x128xf32> to vector<256xf32>
    %21 = vector.shape_cast %20 : vector<256xf32> to vector<256x1xf32>
    %22 = vector.broadcast %21 : vector<256x1xf32> to vector<256x128xf32>
    %23 = arith.subf %19, %22 : vector<256x128xf32>
    %24 = math.exp %23 : vector<256x128xf32>
    %cst_18 = arith.constant dense<0.000000e+00> : vector<256xf32>
    %25 = vector.multi_reduction <add>, %24, %cst_18 [1] : vector<256x128xf32> to vector<256xf32>
    %26 = vector.shape_cast %25 : vector<256xf32> to vector<256x1xf32>
    %27 = math.log %26 : vector<256x1xf32>
    %28 = vector.broadcast %27 : vector<256x1xf32> to vector<256x128xf32>
    %29 = arith.subf %23, %28 : vector<256x128xf32>
    %c0_19 = arith.constant 0 : index
    %c0_20 = arith.constant 0 : index
    %30 = vector.load %arg6[%c0_19, %c0_20] : memref<256x128xf32, #tpu.memory_space<vmem>>, vector<256x128xf32>
    tpu.vector_store %arg6[%c0_19, %c0_20], %29 {strides = array<i32>} : memref<256x128xf32, #tpu.memory_space<vmem>>, vector<256x128xf32>,
    return
  }
}

</mosaic_0001>

<bundles_post_ra>
// kernel: gcn_apply.1
= control target key start
LH: loop header
LB: loop body
LE: loop exit
PB: predicated region body
PF: predicated region fallthrough
CT: control target
= control target key end

     0   :  { %s2998_s2 = inlined_call_operand.vmem [shape: bf16[128,128], index: 2, kind: input, shape index: {}]   ;;  %s2999_s1 = inlined_call_operand.vmem [shape: bf16[256,128], index: 1, kind: input, shape index: {}]   ;;  %s3000_s0 = inlined_call_operand.vmem [shape: bf16[256,256], index: 0, kind: input, shape index: {}]   ;;  %s3001_s4 = inlined_call_operand.vmem [shape: bf16[128,128], index: 4, kind: input, shape index: {}]   ;;  %s3002_s3 = inlined_call_operand.vmem [shape: f32[1,128], index: 3, kind: input, shape index: {}]   ;;  %s3003_s5 = inlined_call_operand.vmem [shape: f32[1,128], index: 5, kind: input, shape index: {}]   ;;  %s3004_s6 = inlined_call_operand.vmem [shape: f32[256,128], index: 6, kind: output, shape index: {}]  }
   0x1   :  { %v2000_v0 = vld [vmem:[%s2998_s2 + $0x38] sm:$0xff]   ;;  %v2001_v1 = vld [vmem:[%s2998_s2 + $0x30] sm:$0xff]   ;;  %v2002_v2 = vld [vmem:[%s2998_s2 + $0x28] sm:$0xff]  }
   0x2   :  { %1904 = vmatprep.subr.bf16.mxu1 %v2000_v0  ;;  %v2003_v3 = vld [vmem:[%s2998_s2 + $0x20] sm:$0xff]   ;;  %v2004_v5 = vld [vmem:[%s2998_s2 + $0x18] sm:$0xff]   ;;  %v2005_v6 = vld [vmem:[%s2998_s2 + $0x10] sm:$0xff]  }
   0x3   :  { %1905 = vmatpush3.bf16.msra.mxu1 %v2000_v0  ;;  %v2008_v4 = vld [vmem:[%s2999_s1] sm:$0xff]   ;;  %v2006_v7 = vld [vmem:[%s2998_s2 + $0x8] sm:$0xff]   ;;  %v2010_v10 = vld [vmem:[%s2999_s1 + $0x10] sm:$0xff]  }
   0x4   :  { %1906 = vmatprep.subr.bf16.mxu1 %v2001_v1  ;;  %1920 = vmatprep.mubr.bf16.mxu1 %v2008_v4  ;;  %v2007_v8 = vld [vmem:[%s2998_s2] sm:$0xff]   ;;  %v2009_v9 = vld [vmem:[%s2999_s1 + $0x8] sm:$0xff]   ;;  %v2011_v11 = vld [vmem:[%s2999_s1 + $0x18] sm:$0xff]  }
   0x5   :  { %v2012_v12 = vld [vmem:[%s2999_s1 + $0x20] sm:$0xff]   ;;  %v2013_v13 = vld [vmem:[%s2999_s1 + $0x28] sm:$0xff]   ;;  %v2014_v14 = vld [vmem:[%s2999_s1 + $0x30] sm:$0xff]  }
   0x6   :  { %v2015_v15 = vld [vmem:[%s2999_s1 + $0x38] sm:$0xff]   ;;  %v2016_v16 = vld [vmem:[%s2999_s1 + $0x40] sm:$0xff]   ;;  %v2017_v17 = vld [vmem:[%s2999_s1 + $0x48] sm:$0xff]  }
   0x7   :  { %1907 = vmatpush3.bf16.msra.mxu1 %v2001_v1  ;;  %v2018_v18 = vld [vmem:[%s2999_s1 + $0x50] sm:$0xff]   ;;  %v2019_v19 = vld [vmem:[%s2999_s1 + $0x58] sm:$0xff]   ;;  %v2020_v20 = vld [vmem:[%s2999_s1 + $0x60] sm:$0xff]  }
   0x8   :  { %1908 = vmatprep.subr.bf16.mxu1 %v2002_v2  ;;  %v2021_v21 = vld [vmem:[%s2999_s1 + $0x68] sm:$0xff]   ;;  %v2022_v22 = vld [vmem:[%s2999_s1 + $0x70] sm:$0xff]   ;;  %v2023_v23 = vld [vmem:[%s2999_s1 + $0x78] sm:$0xff]  }
   0x9   :  { %v2318_v24 = vld [vmem:[%s3000_s0 + $0x4] ss:$8 sps:$4 sm:$0xff]  }
   0xb   :  { %1909 = vmatpush3.bf16.msra.mxu1 %v2002_v2 }
   0xc   :  { %1910 = vmatprep.subr.bf16.mxu1 %v2003_v3 }
   0xf   :  { %1911 = vmatpush3.bf16.msra.mxu1 %v2003_v3 }
  0x10   :  { %1912 = vmatprep.subr.bf16.mxu1 %v2004_v5 }
  0x13   :  { %1913 = vmatpush3.bf16.msra.mxu1 %v2004_v5 }
  0x14   :  { %1914 = vmatprep.subr.bf16.mxu1 %v2005_v6 }
  0x17   :  { %1915 = vmatpush3.bf16.msra.mxu1 %v2005_v6 }
  0x18   :  { %1916 = vmatprep.subr.bf16.mxu1 %v2006_v7 }
  0x1b   :  { %1917 = vmatpush3.bf16.msra.mxu1 %v2006_v7 }
  0x1c   :  { %1918 = vmatprep.subr.bf16.mxu1 %v2007_v8 }
  0x1f   :  { %1919 = vmatpush3.bf16.msra.mxu1 %v2007_v8 }
  0x22   :  { %1921 = vmatmul.mubr.bf16.vlgmr.msra.gmra.mxu1 %v2009_v9  ;;  %v2072_v9 = vld [vmem:[%s3001_s4 + $0x38] sm:$0xff]  }
  0x23   :  { %1924 = vmatprep.mubr.bf16.mxu1 %v2010_v10  ;;  %v2333_v10 = vld [vmem:[%s3000_s0] ss:$8 sps:$4 sm:$0xff]   ;;  %1952 = vmatprep.subr.bf16.mxu0 %v2072_v9 }
  0x24   :  { %1953 = vmatpush3.bf16.msra.mxu0 %v2072_v9 }
  0x2a   :  { %1925 = vmatmul.mubr.bf16.gmra.mxu1 %v2011_v11  ;;  %v2073_v11 = vld [vmem:[%s3001_s4 + $0x30] sm:$0xff]  }
  0x2b   :  { %1928 = vmatprep.mubr.bf16.mxu1 %v2012_v12  ;;  %v2341_v12 = vld [vmem:[%s3000_s0 + $0x14] ss:$8 sps:$4 sm:$0xff]   ;;  %1954 = vmatprep.subr.bf16.mxu0 %v2073_v11 }
  0x2c   :  { %1955 = vmatpush3.bf16.msra.mxu0 %v2073_v11 }
  0x32   :  { %1929 = vmatmul.mubr.bf16.gmra.mxu1 %v2013_v13  ;;  %v2074_v13 = vld [vmem:[%s3001_s4 + $0x28] sm:$0xff]  }
  0x33   :  { %1932 = vmatprep.mubr.bf16.mxu1 %v2014_v14  ;;  %1956 = vmatprep.subr.bf16.mxu0 %v2074_v13  ;;  %v2354_v14 = vld [vmem:[%s3000_s0 + $0x10] ss:$8 sps:$4 sm:$0xff]  }
  0x34   :  { %1957 = vmatpush3.bf16.msra.mxu0 %v2074_v13 }
  0x3a   :  { %1933 = vmatmul.mubr.bf16.gmra.mxu1 %v2015_v15  ;;  %v2359_v15 = vld [vmem:[%s3000_s0 + $0x24] ss:$8 sps:$4 sm:$0xff]  }
  0x3b   :  { %1936 = vmatprep.mubr.bf16.mxu1 %v2016_v16  ;;  %v2366_v16 = vld [vmem:[%s3000_s0 + $0x20] ss:$8 sps:$4 sm:$0xff]  }
  0x42   :  { %1937 = vmatmul.mubr.bf16.gmra.mxu1 %v2017_v17  ;;  %v2371_v17 = vld [vmem:[%s3000_s0 + $0x34] ss:$8 sps:$4 sm:$0xff]  }
  0x43   :  { %1940 = vmatprep.mubr.bf16.mxu1 %v2018_v18  ;;  %v2378_v18 = vld [vmem:[%s3000_s0 + $0x30] ss:$8 sps:$4 sm:$0xff]  }
  0x4a   :  { %1941 = vmatmul.mubr.bf16.gmra.mxu1 %v2019_v19  ;;  %v2383_v19 = vld [vmem:[%s3000_s0 + $0x44] ss:$8 sps:$4 sm:$0xff]  }
  0x4b   :  { %1944 = vmatprep.mubr.bf16.mxu1 %v2020_v20  ;;  %v2390_v20 = vld [vmem:[%s3000_s0 + $0x40] ss:$8 sps:$4 sm:$0xff]  }
  0x52   :  { %1945 = vmatmul.mubr.bf16.gmra.mxu1 %v2021_v21  ;;  %v2395_v21 = vld [vmem:[%s3000_s0 + $0x54] ss:$8 sps:$4 sm:$0xff]  }
  0x53   :  { %1948 = vmatprep.mubr.bf16.mxu1 %v2022_v22  ;;  %v2402_v22 = vld [vmem:[%s3000_s0 + $0x50] ss:$8 sps:$4 sm:$0xff]  }
  0x5a   :  { %1949 = vmatmul.mubr.bf16.gmra.mxu1 %v2023_v23  ;;  %v2407_v23 = vld [vmem:[%s3000_s0 + $0x64] ss:$8 sps:$4 sm:$0xff]  }
  0x5b   :  { %624 = vmatprep.mubr.bf16.mxu1 %v2318_v24 }
  0xe2   :  { %v1922_v25 = vpop.f32.mrf.mxu1 }
  0xe4   :  { %v2321_v26 = vpop.f32.mrf.mxu1 }
  0xe6   :  { %v1923_v27 = vpop.f32.mrf.mxu1 }
  0xe7   :  { %v410_v28 = vpack.c.bf16 %v1923_v27, %v1922_v25  ;;  %v2414_v25 = vld [vmem:[%s3000_s0 + $0x60] ss:$8 sps:$4 sm:$0xff]   ;;  %v2426_v27 = vld [vmem:[%s3000_s0 + $0x70] ss:$8 sps:$4 sm:$0xff]  }
  0xe8   :  { %v2323_v29 = vpop.f32.mrf.mxu1 }
  0xe9   :  { %v409_v30 = vpack.c.bf16 %v2323_v29, %v2321_v26  ;;  %v2419_v26 = vld [vmem:[%s3000_s0 + $0x74] ss:$8 sps:$4 sm:$0xff]   ;;  %v2438_v29 = vld [vmem:[%s3000_s0 + $0x80] ss:$8 sps:$4 sm:$0xff]  }
  0xea   :  { %v1926_v31 = vpop.f32.mrf.mxu1 }
  0xec   :  { %v266_v32 = vpop.f32.mrf.mxu1 }
  0xee   :  { %v1927_v33 = vpop.f32.mrf.mxu1 }
  0xef   :  { %v412_v34 = vpack.c.bf16 %v1927_v33, %v1926_v31  ;;  %v2075_v31 = vld [vmem:[%s3001_s4 + $0x20] sm:$0xff]  }
  0xf0   :  { %v269_v35 = vpop.f32.mrf.mxu1  ;;  %1958 = vmatprep.subr.bf16.mxu0 %v2075_v31  ;;  %v2458_v33 = vld [vmem:[%s3000_s0 + $0xa4] ss:$8 sps:$4 sm:$0xff]  }
  0xf1   :  { %v411_v36 = vpack.c.bf16 %v269_v35, %v266_v32  ;;  %v2453_v32 = vld [vmem:[%s3000_s0 + $0x90] ss:$8 sps:$4 sm:$0xff]   ;;  %1959 = vmatpush3.bf16.msra.mxu0 %v2075_v31 }
  0xf2   :  { %v1930_v37 = vpop.f32.mrf.mxu1  ;;  %v2077_v35 = vld [vmem:[%s3001_s4 + $0x10] sm:$0xff]  }
  0xf4   :  { %v282_v38 = vpop.f32.mrf.mxu1 }
  0xf6   :  { %v1931_v39 = vpop.f32.mrf.mxu1 }
  0xf7   :  { %v414_v2 = vpack.c.bf16 %v1931_v39, %v1930_v37  ;;  %v2476_v37 = vld [vmem:[%s3000_s0 + $0xb4] ss:$8 sps:$4 sm:$0xff]   ;;  %v2079_v39 = vld [vmem:[%s3001_s4] sm:$0xff]  }
  0xf8   :  { %v285_v40 = vpop.f32.mrf.mxu1 }
  0xf9   :  { %v413_v4 = vpack.c.bf16 %v285_v40, %v282_v38  ;;  %v2078_v38 = vld [vmem:[%s3001_s4 + $0x8] sm:$0xff]   ;;  %v2489_v40 = vld [vmem:[%s3000_s0 + $0xb0] ss:$8 sps:$4 sm:$0xff]  }
  0xfa   :  { %v1934_v41 = vpop.f32.mrf.mxu1 }
  0xfc   :  { %v298_v42 = vpop.f32.mrf.mxu1 }
  0xfe   :  { %v1935_v43 = vpop.f32.mrf.mxu1 }
  0xff   :  { %v416_v61 = vpack.c.bf16 %v1935_v43, %v1934_v41  ;;  %v2494_v41 = vld [vmem:[%s3000_s0 + $0xc4] ss:$8 sps:$4 sm:$0xff]   ;;  %v2506_v43 = vld [vmem:[%s3000_s0 + $0xd4] ss:$8 sps:$4 sm:$0xff]  }
 0x100   :  { %v301_v44 = vpop.f32.mrf.mxu1 }
 0x101   :  { %v415_v0 = vpack.c.bf16 %v301_v44, %v298_v42  ;;  %v2501_v42 = vld [vmem:[%s3000_s0 + $0xc0] ss:$8 sps:$4 sm:$0xff]   ;;  %v2513_v44 = vld [vmem:[%s3000_s0 + $0xd0] ss:$8 sps:$4 sm:$0xff]  }
 0x102   :  { %v1938_v45 = vpop.f32.mrf.mxu1  ;;  %3010 = vst [vmem:[#allocation2_spill] sm:$0xff] %v2513_v44 }
 0x104   :  { %v314_v46 = vpop.f32.mrf.mxu1 }
 0x106   :  { %v1939_v47 = vpop.f32.mrf.mxu1 }
 0x107   :  { %v418_v7 = vpack.c.bf16 %v1939_v47, %v1938_v45  ;;  %v2518_v45 = vld [vmem:[%s3000_s0 + $0xe4] ss:$8 sps:$4 sm:$0xff]   ;;  %v2530_v47 = vld [vmem:[%s3000_s0 + $0xf4] ss:$8 sps:$4 sm:$0xff]  }
 0x108   :  { %v317_v48 = vpop.f32.mrf.mxu1  ;;  %3011 = vst [vmem:[#allocation3_spill] sm:$0xff] %v2518_v45  ;;  %3013 = vst [vmem:[#allocation5_spill] sm:$0xff] %v2530_v47 }
 0x109   :  { %v417_v8 = vpack.c.bf16 %v317_v48, %v314_v46  ;;  %v2525_v46 = vld [vmem:[%s3000_s0 + $0xe0] ss:$8 sps:$4 sm:$0xff]   ;;  %v2537_v48 = vld [vmem:[%s3000_s0 + $0xf0] ss:$8 sps:$4 sm:$0xff]  }
 0x10a   :  { %v1942_v49 = vpop.f32.mrf.mxu1  ;;  %3012 = vst [vmem:[#allocation4_spill] sm:$0xff] %v2525_v46  ;;  %3014 = vst [vmem:[#allocation6_spill] sm:$0xff] %v2537_v48 }
 0x10c   :  { %v330_v50 = vpop.f32.mrf.mxu1 }
 0x10e   :  { %v1943_v51 = vpop.f32.mrf.mxu1 }
 0x10f   :  { %v420_v5 = vpack.c.bf16 %v1943_v51, %v1942_v49 }
 0x110   :  { %v333_v52 = vpop.f32.mrf.mxu1 }
 0x111   :  { %v419_v6 = vpack.c.bf16 %v333_v52, %v330_v50 }
 0x112   :  { %v1946_v53 = vpop.f32.mrf.mxu1 }
 0x114   :  { %v346_v54 = vpop.f32.mrf.mxu1 }
 0x116   :  { %v1947_v55 = vpop.f32.mrf.mxu1 }
 0x117   :  { %v422_v1 = vpack.c.bf16 %v1947_v55, %v1946_v53  ;;  %v2543_v53 = vld [vmem:[%s3002_s3] ss:$0 sm:$0xff] }
 0x118   :  { %v349_v56 = vpop.f32.mrf.mxu1 }
 0x119   :  { %v421_v3 = vpack.c.bf16 %v349_v56, %v346_v54 }
 0x11a   :  { %v1950_v57 = vpop.f32.mrf.mxu1 }
 0x11c   :  { %v362_v58 = vpop.f32.mrf.mxu1 }
 0x11e   :  { %v1951_v59 = vpop.f32.mrf.mxu1 }
 0x11f   :  { %v424_v60 = vpack.c.bf16 %v1951_v59, %v1950_v57 }
 0x120   :  { %v365_v62 = vpop.f32.mrf.mxu1 }
 0x121   :  { %v423_v63 = vpack.c.bf16 %v365_v62, %v362_v58  ;;  %1656 = vmatprep.subr.bf16.mxu1 %v424_v60 }
 0x122   :  { %1657 = vmatpush3.bf16.msra.mxu1 %v416_v61 }
 0x123   :  { %1658 = vmatprep.subr.bf16.mxu1 %v423_v63 }
 0x126   :  { %1659 = vmatpush3.bf16.msra.mxu1 %v415_v0 }
 0x127   :  { %1660 = vmatprep.subr.bf16.mxu1 %v422_v1 }
 0x12a   :  { %1661 = vmatpush3.bf16.msra.mxu1 %v414_v2 }
 0x12b   :  { %1662 = vmatprep.subr.bf16.mxu1 %v421_v3 }
 0x12e   :  { %1663 = vmatpush3.bf16.msra.mxu1 %v413_v4 }
 0x12f   :  { %1664 = vmatprep.subr.bf16.mxu1 %v420_v5 }
 0x132   :  { %1665 = vmatpush3.bf16.msra.mxu1 %v412_v34  ;;  %v2076_v34 = vld [vmem:[%s3001_s4 + $0x18] sm:$0xff]  }
 0x133   :  { %1666 = vmatprep.subr.bf16.mxu1 %v419_v6  ;;  %1960 = vmatprep.subr.bf16.mxu0 %v2076_v34 }
 0x134   :  { %1961 = vmatpush3.bf16.msra.mxu0 %v2076_v34 }
 0x135   :  { %1962 = vmatprep.subr.bf16.mxu0 %v2077_v35 }
 0x136   :  { %1667 = vmatpush3.bf16.msra.mxu1 %v411_v36  ;;  %v2471_v36 = vld [vmem:[%s3000_s0 + $0xa0] ss:$8 sps:$4 sm:$0xff]  }
 0x137   :  { %1668 = vmatprep.subr.bf16.mxu1 %v418_v7 }
 0x138   :  { %1963 = vmatpush3.bf16.msra.mxu0 %v2077_v35 }
 0x139   :  { %1964 = vmatprep.subr.bf16.mxu0 %v2078_v38 }
 0x13a   :  { %1669 = vmatpush3.bf16.msra.mxu1 %v410_v28  ;;  %v2431_v28 = vld [vmem:[%s3000_s0 + $0x84] ss:$8 sps:$4 sm:$0xff]  }
 0x13b   :  { %1670 = vmatprep.subr.bf16.mxu1 %v417_v8 }
 0x13c   :  { %1965 = vmatpush3.bf16.msra.mxu0 %v2078_v38 }
 0x13d   :  { %1966 = vmatprep.subr.bf16.mxu0 %v2079_v39 }
 0x13e   :  { %1671 = vmatpush3.bf16.msra.mxu1 %v409_v30  ;;  %v2443_v30 = vld [vmem:[%s3000_s0 + $0x94] ss:$8 sps:$4 sm:$0xff]  }
 0x140   :  { %1967 = vmatpush3.bf16.msra.mxu0 %v2079_v39 }
 0x141   :  { %625 = vmatmul.mubr.bf16.vlgmr.msra.gmra.mxu1 %v2333_v10 }
 0x142   :  { %632 = vmatprep.mubr.bf16.mxu1 %v2341_v12 }
 0x149   :  { %633 = vmatmul.mubr.bf16.gmra.mxu1 %v2354_v14 }
 0x14a   :  { %640 = vmatprep.mubr.bf16.mxu1 %v2359_v15 }
 0x151   :  { %641 = vmatmul.mubr.bf16.gmra.mxu1 %v2366_v16 }
 0x152   :  { %648 = vmatprep.mubr.bf16.mxu1 %v2371_v17 }
 0x159   :  { %649 = vmatmul.mubr.bf16.gmra.mxu1 %v2378_v18 }
 0x15a   :  { %656 = vmatprep.mubr.bf16.mxu1 %v2383_v19 }
 0x161   :  { %657 = vmatmul.mubr.bf16.gmra.mxu1 %v2390_v20 }
 0x162   :  { %664 = vmatprep.mubr.bf16.mxu1 %v2395_v21 }
 0x169   :  { %665 = vmatmul.mubr.bf16.gmra.mxu1 %v2402_v22 }
 0x16a   :  { %672 = vmatprep.mubr.bf16.mxu1 %v2407_v23 }
 0x171   :  { %673 = vmatmul.mubr.bf16.gmra.mxu1 %v2414_v25 }
 0x172   :  { %680 = vmatprep.mubr.bf16.mxu1 %v2419_v26 }
 0x179   :  { %681 = vmatmul.mubr.bf16.gmra.mxu1 %v2426_v27 }
 0x17a   :  { %688 = vmatprep.mubr.bf16.mxu1 %v2431_v28 }
 0x181   :  { %689 = vmatmul.mubr.bf16.gmra.mxu1 %v2438_v29 }
 0x182   :  { %696 = vmatprep.mubr.bf16.mxu1 %v2443_v30 }
 0x189   :  { %697 = vmatmul.mubr.bf16.gmra.mxu1 %v2453_v32 }
 0x18a   :  { %704 = vmatprep.mubr.bf16.mxu1 %v2458_v33 }
 0x191   :  { %705 = vmatmul.mubr.bf16.gmra.mxu1 %v2471_v36 }
 0x192   :  { %712 = vmatprep.mubr.bf16.mxu1 %v2476_v37 }
 0x199   :  { %713 = vmatmul.mubr.bf16.gmra.mxu1 %v2489_v40 }
 0x19a   :  { %720 = vmatprep.mubr.bf16.mxu1 %v2494_v41 }
 0x1a1   :  { %721 = vmatmul.mubr.bf16.gmra.mxu1 %v2501_v42 }
 0x1a2   :  { %728 = vmatprep.mubr.bf16.mxu1 %v2506_v43 }
 0x1a9   :  { %729 = vmatmul.mubr.bf16.gmra.mxu1 %v2513_v44 }
 0x1aa   :  { %736 = vmatprep.mubr.bf16.mxu1 %v2518_v45 }
 0x1b1   :  { %737 = vmatmul.mubr.bf16.gmra.mxu1 %v2525_v46 }
 0x1b2   :  { %744 = vmatprep.mubr.bf16.mxu1 %v2530_v47 }
 0x1b9   :  { %745 = vmatmul.mubr.bf16.gmra.mxu1 %v2537_v48 }
 0x201   :  { %v1672_v49 = vpop.f32.mrf.mxu1 }
 0x203   :  { %v1673_v50 = vpop.f32.mrf.mxu1 }
 0x204   :  { %v1674_v51 = vadd.f32 %v1673_v50, %v1672_v49 }
 0x205   :  { %v1675_v52 = vpop.f32.mrf.mxu1 }
 0x206   :  { %v627_v56 = vadd.f32 %v1674_v51, %v2543_v53 }
 0x207   :  { %v1676_v54 = vpop.f32.mrf.mxu1 }
 0x208   :  { %v1677_v55 = vadd.f32 %v1676_v54, %v1675_v52  ;;  %v753_v61 = vmax.f32 %v627_v56, 0.0 }
 0x209   :  { %v1678_v57 = vpop.f32.mrf.mxu1 }
 0x20a   :  { %v630_v58 = vadd.f32 %v1677_v55, %v2543_v53 }
 0x20b   :  { %v1679_v59 = vpop.f32.mrf.mxu1 }
 0x20c   :  { %v1680_v60 = vadd.f32 %v1679_v59, %v1678_v57  ;;  %v754_v62 = vmax.f32 %v630_v58, 0.0 }
 0x20d   :  { %v1681_v63 = vpop.f32.mrf.mxu1 }
 0x20e   :  { %v785_v0 = vpack.c.bf16 %v754_v62, %v753_v61  ;;  %v635_v2 = vadd.f32 %v1680_v60, %v2543_v53 }
 0x20f   :  { %v1682_v1 = vpop.f32.mrf.mxu1 }
 0x210   :  { %v1683_v3 = vadd.f32 %v1682_v1, %v1681_v63  ;;  %1968 = vmatprep.mubr.bf16.mxu0 %v785_v0  ;;  %v755_v7 = vmax.f32 %v635_v2, 0.0 }
 0x211   :  { %v1684_v4 = vpop.f32.mrf.mxu1 }
 0x212   :  { %v638_v5 = vadd.f32 %v1683_v3, %v2543_v53 }
 0x213   :  { %v1685_v6 = vpop.f32.mrf.mxu1 }
 0x214   :  { %v756_v8 = vmax.f32 %v638_v5, 0.0  ;;  %v1686_v9 = vadd.f32 %v1685_v6, %v1684_v4 }
 0x215   :  { %v1687_v11 = vpop.f32.mrf.mxu1 }
 0x216   :  { %v786_v13 = vpack.c.bf16 %v756_v8, %v755_v7  ;;  %v643_v34 = vadd.f32 %v1686_v9, %v2543_v53 }
 0x217   :  { %v1688_v31 = vpop.f32.mrf.mxu1 }
 0x218   :  { %v1689_v35 = vadd.f32 %v1688_v31, %v1687_v11  ;;  %1969 = vmatmul.mubr.bf16.vlgmr.msra.gmra.mxu0 %v786_v13  ;;  %v757_v50 = vmax.f32 %v643_v34, 0.0 }
 0x219   :  { %v1690_v38 = vpop.f32.mrf.mxu1 }
 0x21a   :  { %v646_v39 = vadd.f32 %v1689_v35, %v2543_v53 }
 0x21b   :  { %v1691_v49 = vpop.f32.mrf.mxu1 }
 0x21c   :  { %v758_v51 = vmax.f32 %v646_v39, 0.0  ;;  %v1692_v52 = vadd.f32 %v1691_v49, %v1690_v38 }
 0x21d   :  { %v1693_v54 = vpop.f32.mrf.mxu1 }
 0x21e   :  { %v787_v55 = vpack.c.bf16 %v758_v51, %v757_v50  ;;  %v651_v57 = vadd.f32 %v1692_v52, %v2543_v53 }
 0x21f   :  { %v1694_v56 = vpop.f32.mrf.mxu1 }
 0x220   :  { %v1695_v58 = vadd.f32 %v1694_v56, %v1693_v54  ;;  %1972 = vmatprep.mubr.bf16.mxu0 %v787_v55  ;;  %v759_v62 = vmax.f32 %v651_v57, 0.0 }
 0x221   :  { %v1696_v59 = vpop.f32.mrf.mxu1 }
 0x222   :  { %v654_v60 = vadd.f32 %v1695_v58, %v2543_v53 }
 0x223   :  { %v1697_v61 = vpop.f32.mrf.mxu1 }
 0x224   :  { %v760_v63 = vmax.f32 %v654_v60, 0.0  ;;  %v1698_v0 = vadd.f32 %v1697_v61, %v1696_v59 }
 0x225   :  { %v1699_v1 = vpop.f32.mrf.mxu1 }
 0x226   :  { %v788_v2 = vpack.c.bf16 %v760_v63, %v759_v62  ;;  %v659_v4 = vadd.f32 %v1698_v0, %v2543_v53 }
 0x227   :  { %v1700_v3 = vpop.f32.mrf.mxu1 }
 0x228   :  { %v1701_v5 = vadd.f32 %v1700_v3, %v1699_v1  ;;  %1973 = vmatmul.mubr.bf16.gmra.mxu0 %v788_v2  ;;  %v761_v9 = vmax.f32 %v659_v4, 0.0 }
 0x229   :  { %v1702_v6 = vpop.f32.mrf.mxu1 }
 0x22a   :  { %v662_v7 = vadd.f32 %v1701_v5, %v2543_v53 }
 0x22b   :  { %v1703_v8 = vpop.f32.mrf.mxu1 }
 0x22c   :  { %v762_v11 = vmax.f32 %v662_v7, 0.0  ;;  %v1704_v13 = vadd.f32 %v1703_v8, %v1702_v6 }
 0x22d   :  { %v1705_v31 = vpop.f32.mrf.mxu1 }
 0x22e   :  { %v789_v34 = vpack.c.bf16 %v762_v11, %v761_v9  ;;  %v667_v38 = vadd.f32 %v1704_v13, %v2543_v53 }
 0x22f   :  { %v1706_v35 = vpop.f32.mrf.mxu1 }
 0x230   :  { %v1707_v39 = vadd.f32 %v1706_v35, %v1705_v31  ;;  %1976 = vmatprep.mubr.bf16.mxu0 %v789_v34  ;;  %v763_v52 = vmax.f32 %v667_v38, 0.0 }
 0x231   :  { %v1708_v49 = vpop.f32.mrf.mxu1 }
 0x232   :  { %v670_v50 = vadd.f32 %v1707_v39, %v2543_v53 }
 0x233   :  { %v1709_v51 = vpop.f32.mrf.mxu1 }
 0x234   :  { %v764_v54 = vmax.f32 %v670_v50, 0.0  ;;  %v1710_v55 = vadd.f32 %v1709_v51, %v1708_v49 }
 0x235   :  { %v1711_v56 = vpop.f32.mrf.mxu1 }
 0x236   :  { %v790_v57 = vpack.c.bf16 %v764_v54, %v763_v52  ;;  %v675_v59 = vadd.f32 %v1710_v55, %v2543_v53 }
 0x237   :  { %v1712_v58 = vpop.f32.mrf.mxu1 }
 0x238   :  { %v1713_v60 = vadd.f32 %v1712_v58, %v1711_v56  ;;  %1977 = vmatmul.mubr.bf16.gmra.mxu0 %v790_v57  ;;  %v765_v0 = vmax.f32 %v675_v59, 0.0 }
 0x239   :  { %v1714_v61 = vpop.f32.mrf.mxu1 }
 0x23a   :  { %v678_v62 = vadd.f32 %v1713_v60, %v2543_v53 }
 0x23b   :  { %v1715_v63 = vpop.f32.mrf.mxu1 }
 0x23c   :  { %v766_v1 = vmax.f32 %v678_v62, 0.0  ;;  %v1716_v2 = vadd.f32 %v1715_v63, %v1714_v61 }
 0x23d   :  { %v1717_v3 = vpop.f32.mrf.mxu1 }
 0x23e   :  { %v791_v4 = vpack.c.bf16 %v766_v1, %v765_v0  ;;  %v683_v6 = vadd.f32 %v1716_v2, %v2543_v53 }
 0x23f   :  { %v1718_v5 = vpop.f32.mrf.mxu1 }
 0x240   :  { %v1719_v7 = vadd.f32 %v1718_v5, %v1717_v3  ;;  %1980 = vmatprep.mubr.bf16.mxu0 %v791_v4  ;;  %v767_v13 = vmax.f32 %v683_v6, 0.0 }
 0x241   :  { %v1720_v8 = vpop.f32.mrf.mxu1 }
 0x242   :  { %v686_v9 = vadd.f32 %v1719_v7, %v2543_v53 }
 0x243   :  { %v1721_v11 = vpop.f32.mrf.mxu1 }
 0x244   :  { %v768_v31 = vmax.f32 %v686_v9, 0.0  ;;  %v1722_v34 = vadd.f32 %v1721_v11, %v1720_v8 }
 0x245   :  { %v1723_v35 = vpop.f32.mrf.mxu1 }
 0x246   :  { %v792_v38 = vpack.c.bf16 %v768_v31, %v767_v13  ;;  %v691_v49 = vadd.f32 %v1722_v34, %v2543_v53 }
 0x247   :  { %v1724_v39 = vpop.f32.mrf.mxu1 }
 0x248   :  { %v1725_v50 = vadd.f32 %v1724_v39, %v1723_v35  ;;  %1981 = vmatmul.mubr.bf16.gmra.mxu0 %v792_v38  ;;  %v769_v55 = vmax.f32 %v691_v49, 0.0 }
 0x249   :  { %v1726_v51 = vpop.f32.mrf.mxu1 }
 0x24a   :  { %v694_v52 = vadd.f32 %v1725_v50, %v2543_v53 }
 0x24b   :  { %v1727_v54 = vpop.f32.mrf.mxu1 }
 0x24c   :  { %v770_v56 = vmax.f32 %v694_v52, 0.0  ;;  %v1728_v57 = vadd.f32 %v1727_v54, %v1726_v51 }
 0x24d   :  { %v1729_v58 = vpop.f32.mrf.mxu1 }
 0x24e   :  { %v793_v59 = vpack.c.bf16 %v770_v56, %v769_v55  ;;  %v699_v61 = vadd.f32 %v1728_v57, %v2543_v53 }
 0x24f   :  { %v1730_v60 = vpop.f32.mrf.mxu1 }
 0x250   :  { %v1731_v62 = vadd.f32 %v1730_v60, %v1729_v58  ;;  %1984 = vmatprep.mubr.bf16.mxu0 %v793_v59  ;;  %v771_v2 = vmax.f32 %v699_v61, 0.0 }
 0x251   :  { %v1732_v63 = vpop.f32.mrf.mxu1 }
 0x252   :  { %v702_v0 = vadd.f32 %v1731_v62, %v2543_v53 }
 0x253   :  { %v1733_v1 = vpop.f32.mrf.mxu1 }
 0x254   :  { %v772_v3 = vmax.f32 %v702_v0, 0.0  ;;  %v1734_v4 = vadd.f32 %v1733_v1, %v1732_v63 }
 0x255   :  { %v1735_v5 = vpop.f32.mrf.mxu1 }
 0x256   :  { %v794_v6 = vpack.c.bf16 %v772_v3, %v771_v2  ;;  %v707_v8 = vadd.f32 %v1734_v4, %v2543_v53 }
 0x257   :  { %v1736_v7 = vpop.f32.mrf.mxu1 }
 0x258   :  { %v1737_v9 = vadd.f32 %v1736_v7, %v1735_v5  ;;  %1985 = vmatmul.mubr.bf16.gmra.mxu0 %v794_v6  ;;  %v773_v34 = vmax.f32 %v707_v8, 0.0 }
 0x259   :  { %v1738_v11 = vpop.f32.mrf.mxu1 }
 0x25a   :  { %v710_v13 = vadd.f32 %v1737_v9, %v2543_v53 }
 0x25b   :  { %v1739_v31 = vpop.f32.mrf.mxu1 }
 0x25c   :  { %v774_v35 = vmax.f32 %v710_v13, 0.0  ;;  %v1740_v38 = vadd.f32 %v1739_v31, %v1738_v11 }
 0x25d   :  { %v1741_v39 = vpop.f32.mrf.mxu1 }
 0x25e   :  { %v795_v49 = vpack.c.bf16 %v774_v35, %v773_v34  ;;  %v715_v51 = vadd.f32 %v1740_v38, %v2543_v53 }
 0x25f   :  { %v1742_v50 = vpop.f32.mrf.mxu1 }
 0x260   :  { %v1743_v52 = vadd.f32 %v1742_v50, %v1741_v39  ;;  %1988 = vmatprep.mubr.bf16.mxu0 %v795_v49  ;;  %v775_v57 = vmax.f32 %v715_v51, 0.0 }
 0x261   :  { %v1744_v54 = vpop.f32.mrf.mxu1 }
 0x262   :  { %v718_v55 = vadd.f32 %v1743_v52, %v2543_v53 }
 0x263   :  { %v1745_v56 = vpop.f32.mrf.mxu1 }
 0x264   :  { %v776_v58 = vmax.f32 %v718_v55, 0.0  ;;  %v1746_v59 = vadd.f32 %v1745_v56, %v1744_v54 }
 0x265   :  { %v1747_v60 = vpop.f32.mrf.mxu1 }
 0x266   :  { %v796_v61 = vpack.c.bf16 %v776_v58, %v775_v57  ;;  %v723_v63 = vadd.f32 %v1746_v59, %v2543_v53 }
 0x267   :  { %v1748_v62 = vpop.f32.mrf.mxu1 }
 0x268   :  { %v1749_v0 = vadd.f32 %v1748_v62, %v1747_v60  ;;  %1989 = vmatmul.mubr.bf16.gmra.mxu0 %v796_v61  ;;  %v777_v4 = vmax.f32 %v723_v63, 0.0 }
 0x269   :  { %v1750_v1 = vpop.f32.mrf.mxu1 }
 0x26a   :  { %v726_v2 = vadd.f32 %v1749_v0, %v2543_v53 }
 0x26b   :  { %v1751_v3 = vpop.f32.mrf.mxu1 }
 0x26c   :  { %v778_v5 = vmax.f32 %v726_v2, 0.0  ;;  %v1752_v6 = vadd.f32 %v1751_v3, %v1750_v1 }
 0x26d   :  { %v1753_v7 = vpop.f32.mrf.mxu1 }
 0x26e   :  { %v797_v8 = vpack.c.bf16 %v778_v5, %v777_v4  ;;  %v731_v11 = vadd.f32 %v1752_v6, %v2543_v53 }
 0x26f   :  { %v1754_v9 = vpop.f32.mrf.mxu1 }
 0x270   :  { %v1755_v13 = vadd.f32 %v1754_v9, %v1753_v7  ;;  %1992 = vmatprep.mubr.bf16.mxu0 %v797_v8  ;;  %v779_v38 = vmax.f32 %v731_v11, 0.0 }
 0x271   :  { %v1756_v31 = vpop.f32.mrf.mxu1 }
 0x272   :  { %v734_v34 = vadd.f32 %v1755_v13, %v2543_v53 }
 0x273   :  { %v1757_v35 = vpop.f32.mrf.mxu1 }
 0x274   :  { %v780_v39 = vmax.f32 %v734_v34, 0.0  ;;  %v1758_v49 = vadd.f32 %v1757_v35, %v1756_v31 }
 0x275   :  { %v1759_v50 = vpop.f32.mrf.mxu1 }
 0x276   :  { %v798_v51 = vpack.c.bf16 %v780_v39, %v779_v38  ;;  %v739_v54 = vadd.f32 %v1758_v49, %v2543_v53 }
 0x277   :  { %v1760_v52 = vpop.f32.mrf.mxu1 }
 0x278   :  { %v1761_v55 = vadd.f32 %v1760_v52, %v1759_v50  ;;  %1993 = vmatmul.mubr.bf16.gmra.mxu0 %v798_v51  ;;  %v781_v59 = vmax.f32 %v739_v54, 0.0 }
 0x279   :  { %v1762_v56 = vpop.f32.mrf.mxu1 }
 0x27a   :  { %v742_v57 = vadd.f32 %v1761_v55, %v2543_v53 }
 0x27b   :  { %v1763_v58 = vpop.f32.mrf.mxu1 }
 0x27c   :  { %v782_v60 = vmax.f32 %v742_v57, 0.0  ;;  %v1764_v61 = vadd.f32 %v1763_v58, %v1762_v56 }
 0x27d   :  { %v1765_v62 = vpop.f32.mrf.mxu1 }
 0x27e   :  { %v799_v63 = vpack.c.bf16 %v782_v60, %v781_v59  ;;  %v747_v1 = vadd.f32 %v1764_v61, %v2543_v53 }
 0x27f   :  { %v1766_v0 = vpop.f32.mrf.mxu1 }
 0x280   :  { %v1767_v2 = vadd.f32 %v1766_v0, %v1765_v62  ;;  %1996 = vmatprep.mubr.bf16.mxu0 %v799_v63  ;;  %v783_v4 = vmax.f32 %v747_v1, 0.0 }
 0x282   :  { %v750_v3 = vadd.f32 %v1767_v2, %v2543_v53 }
 0x284   :  { %v784_v5 = vmax.f32 %v750_v3, 0.0 }
 0x286   :  { %v800_v6 = vpack.c.bf16 %v784_v5, %v783_v4 }
 0x288   :  { %1997 = vmatmul.mubr.bf16.gmra.mxu0 %v800_v6 }
 0x289   :  { %1081 = vmatprep.mubr.bf16.mxu0 %v2318_v24 }
 0x2d8   :  { %v1970_v7 = vpop.f32.mrf.mxu0 }
 0x2da   :  { %v899_v8 = vpop.f32.mrf.mxu0 }
 0x2dc   :  { %v1971_v9 = vpop.f32.mrf.mxu0 }
 0x2dd   :  { %v1027_v11 = vpack.c.bf16 %v1971_v9, %v1970_v7 }
 0x2de   :  { %v902_v13 = vpop.f32.mrf.mxu0 }
 0x2df   :  { %v1026_v31 = vpack.c.bf16 %v902_v13, %v899_v8 }
 0x2e8   :  { %v1974_v34 = vpop.f32.mrf.mxu0 }
 0x2ea   :  { %v915_v35 = vpop.f32.mrf.mxu0 }
 0x2ec   :  { %v1975_v38 = vpop.f32.mrf.mxu0 }
 0x2ed   :  { %v1029_v39 = vpack.c.bf16 %v1975_v38, %v1974_v34 }
 0x2ee   :  { %v918_v49 = vpop.f32.mrf.mxu0 }
 0x2ef   :  { %v1028_v50 = vpack.c.bf16 %v918_v49, %v915_v35 }
 0x2f8   :  { %v1978_v51 = vpop.f32.mrf.mxu0 }
 0x2fa   :  { %v931_v53 = vpop.f32.mrf.mxu0 }
 0x2fc   :  { %v1979_v52 = vpop.f32.mrf.mxu0 }
 0x2fd   :  { %v1031_v48 = vpack.c.bf16 %v1979_v52, %v1978_v51 }
 0x2fe   :  { %v934_v54 = vpop.f32.mrf.mxu0 }
 0x2ff   :  { %v1030_v46 = vpack.c.bf16 %v934_v54, %v931_v53 }
 0x308   :  { %v1982_v55 = vpop.f32.mrf.mxu0 }
 0x30a   :  { %v947_v56 = vpop.f32.mrf.mxu0 }
 0x30c   :  { %v1983_v57 = vpop.f32.mrf.mxu0 }
 0x30d   :  { %v1033_v13 = vpack.c.bf16 %v1983_v57, %v1982_v55 }
 0x30e   :  { %v950_v24 = vpop.f32.mrf.mxu0 }
 0x30f   :  { %v1032_v38 = vpack.c.bf16 %v950_v24, %v947_v56 }
 0x318   :  { %v1986_v58 = vpop.f32.mrf.mxu0 }
 0x31a   :  { %v963_v59 = vpop.f32.mrf.mxu0 }
 0x31c   :  { %v1987_v60 = vpop.f32.mrf.mxu0 }
 0x31d   :  { %v1035_v55 = vpack.c.bf16 %v1987_v60, %v1986_v58 }
 0x31e   :  { %v966_v61 = vpop.f32.mrf.mxu0 }
 0x31f   :  { %v1034_v57 = vpack.c.bf16 %v966_v61, %v963_v59 }
 0x328   :  { %v1990_v62 = vpop.f32.mrf.mxu0 }
 0x32a   :  { %v979_v63 = vpop.f32.mrf.mxu0 }
 0x32c   :  { %v1991_v0 = vpop.f32.mrf.mxu0 }
 0x32d   :  { %v1037_v45 = vpack.c.bf16 %v1991_v0, %v1990_v62 }
 0x32e   :  { %v982_v1 = vpop.f32.mrf.mxu0 }
 0x32f   :  { %v1036_v44 = vpack.c.bf16 %v982_v1, %v979_v63 }
 0x338   :  { %v1994_v2 = vpop.f32.mrf.mxu0 }
 0x33a   :  { %v995_v3 = vpop.f32.mrf.mxu0 }
 0x33c   :  { %v1995_v4 = vpop.f32.mrf.mxu0 }
 0x33d   :  { %v1039_v49 = vpack.c.bf16 %v1995_v4, %v1994_v2 }
 0x33e   :  { %v998_v5 = vpop.f32.mrf.mxu0 }
 0x33f   :  { %v1038_v47 = vpack.c.bf16 %v998_v5, %v995_v3 }
 0x348   :  { %v1998_v6 = vpop.f32.mrf.mxu0 }
 0x34a   :  { %v1011_v7 = vpop.f32.mrf.mxu0 }
 0x34c   :  { %v1999_v8 = vpop.f32.mrf.mxu0 }
 0x34d   :  { %v1041_v9 = vpack.c.bf16 %v1999_v8, %v1998_v6 }
 0x34e   :  { %v1014_v34 = vpop.f32.mrf.mxu0 }
 0x34f   :  { %v1040_v35 = vpack.c.bf16 %v1014_v34, %v1011_v7  ;;  %1792 = vmatprep.subr.bf16.mxu0 %v1041_v9 }
 0x350   :  { %1793 = vmatpush3.bf16.msra.mxu0 %v1033_v13 }
 0x351   :  { %1794 = vmatprep.subr.bf16.mxu0 %v1040_v35 }
 0x354   :  { %1795 = vmatpush3.bf16.msra.mxu0 %v1032_v38 }
 0x355   :  { %1796 = vmatprep.subr.bf16.mxu0 %v1039_v49 }
 0x358   :  { %1797 = vmatpush3.bf16.msra.mxu0 %v1031_v48 }
 0x359   :  { %1798 = vmatprep.subr.bf16.mxu0 %v1038_v47 }
 0x35c   :  { %1799 = vmatpush3.bf16.msra.mxu0 %v1030_v46 }
 0x35d   :  { %1800 = vmatprep.subr.bf16.mxu0 %v1037_v45 }
 0x360   :  { %1801 = vmatpush3.bf16.msra.mxu0 %v1029_v39 }
 0x361   :  { %1802 = vmatprep.subr.bf16.mxu0 %v1036_v44 }
 0x364   :  { %1803 = vmatpush3.bf16.msra.mxu0 %v1028_v50 }
 0x365   :  { %1804 = vmatprep.subr.bf16.mxu0 %v1035_v55 }
 0x368   :  { %1805 = vmatpush3.bf16.msra.mxu0 %v1027_v11 }
 0x369   :  { %1806 = vmatprep.subr.bf16.mxu0 %v1034_v57 }
 0x36c   :  { %1807 = vmatpush3.bf16.msra.mxu0 %v1026_v31 }
 0x36f   :  { %1082 = vmatmul.mubr.bf16.vlgmr.msra.gmra.mxu0 %v2333_v10  ;;  %v3015_v10 = vld [vmem:[#allocation2_spill] sm:$0xff] }
 0x370   :  { %1089 = vmatprep.mubr.bf16.mxu0 %v2341_v12  ;;  %v3016_v12 = vld [vmem:[#allocation3_spill] sm:$0xff] }
 0x377   :  { %1090 = vmatmul.mubr.bf16.gmra.mxu0 %v2354_v14  ;;  %v3017_v14 = vld [vmem:[#allocation4_spill] sm:$0xff] }
 0x378   :  { %1097 = vmatprep.mubr.bf16.mxu0 %v2359_v15  ;;  %v3018_v15 = vld [vmem:[#allocation5_spill] sm:$0xff] }
 0x37f   :  { %1098 = vmatmul.mubr.bf16.gmra.mxu0 %v2366_v16  ;;  %v3019_v16 = vld [vmem:[#allocation6_spill] sm:$0xff] }
 0x380   :  { %1105 = vmatprep.mubr.bf16.mxu0 %v2371_v17 }
 0x387   :  { %1106 = vmatmul.mubr.bf16.gmra.mxu0 %v2378_v18 }
 0x388   :  { %1113 = vmatprep.mubr.bf16.mxu0 %v2383_v19  ;;  %v2612_v19 = vld [vmem:[%s3003_s5] ss:$0 sm:$0xff] }
 0x38f   :  { %1114 = vmatmul.mubr.bf16.gmra.mxu0 %v2390_v20 }
 0x390   :  { %1121 = vmatprep.mubr.bf16.mxu0 %v2395_v21 }
 0x397   :  { %1122 = vmatmul.mubr.bf16.gmra.mxu0 %v2402_v22 }
 0x398   :  { %1129 = vmatprep.mubr.bf16.mxu0 %v2407_v23 }
 0x39f   :  { %1130 = vmatmul.mubr.bf16.gmra.mxu0 %v2414_v25 }
 0x3a0   :  { %1137 = vmatprep.mubr.bf16.mxu0 %v2419_v26 }
 0x3a7   :  { %1138 = vmatmul.mubr.bf16.gmra.mxu0 %v2426_v27 }
 0x3a8   :  { %1145 = vmatprep.mubr.bf16.mxu0 %v2431_v28 }
 0x3af   :  { %1146 = vmatmul.mubr.bf16.gmra.mxu0 %v2438_v29 }
 0x3b0   :  { %1153 = vmatprep.mubr.bf16.mxu0 %v2443_v30 }
 0x3b7   :  { %1154 = vmatmul.mubr.bf16.gmra.mxu0 %v2453_v32 }
 0x3b8   :  { %1161 = vmatprep.mubr.bf16.mxu0 %v2458_v33 }
 0x3bf   :  { %1162 = vmatmul.mubr.bf16.gmra.mxu0 %v2471_v36 }
 0x3c0   :  { %1169 = vmatprep.mubr.bf16.mxu0 %v2476_v37 }
 0x3c7   :  { %1170 = vmatmul.mubr.bf16.gmra.mxu0 %v2489_v40 }
 0x3c8   :  { %1177 = vmatprep.mubr.bf16.mxu0 %v2494_v41 }
 0x3cf   :  { %1178 = vmatmul.mubr.bf16.gmra.mxu0 %v2501_v42 }
 0x3d0   :  { %1185 = vmatprep.mubr.bf16.mxu0 %v2506_v43 }
 0x3d7   :  { %1186 = vmatmul.mubr.bf16.gmra.mxu0 %v3015_v10 }
 0x3d8   :  { %1193 = vmatprep.mubr.bf16.mxu0 %v3016_v12 }
 0x3df   :  { %1194 = vmatmul.mubr.bf16.gmra.mxu0 %v3017_v14 }
 0x3e0   :  { %1201 = vmatprep.mubr.bf16.mxu0 %v3018_v15 }
 0x3e7   :  { %1202 = vmatmul.mubr.bf16.gmra.mxu0 %v3019_v16 }
 0x42f   :  { %v1808_v17 = vpop.f32.mrf.mxu0 }
 0x431   :  { %v1809_v18 = vpop.f32.mrf.mxu0 }
 0x432   :  { %v1810_v20 = vadd.f32 %v1809_v18, %v1808_v17 }
 0x433   :  { %v1811_v21 = vpop.f32.mrf.mxu0 }
 0x434   :  { %v2615_v22 = vadd.f32 %v1810_v20, %v2612_v19 }
 0x435   :  { %v1812_v23 = vpop.f32.mrf.mxu0 }
 0x436   :  { %v1813_v25 = vadd.f32 %v1812_v23, %v1811_v21  ;;  %1210 = vmax.xlane.f32.xlu0 %v2615_v22 }
 0x437   :  { %v1814_v26 = vpop.f32.mrf.mxu0 }
 0x438   :  { %v2619_v27 = vadd.f32 %v1813_v25, %v2612_v19 }
 0x439   :  { %v1815_v28 = vpop.f32.mrf.mxu0 }
 0x43a   :  { %v1816_v29 = vadd.f32 %v1815_v28, %v1814_v26  ;;  %1212 = vmax.xlane.f32.xlu0 %v2619_v27 }
 0x43b   :  { %v1817_v30 = vpop.f32.mrf.mxu0 }
 0x43c   :  { %v2623_v32 = vadd.f32 %v1816_v29, %v2612_v19 }
 0x43d   :  { %v1818_v33 = vpop.f32.mrf.mxu0 }
 0x43e   :  { %v1819_v36 = vadd.f32 %v1818_v33, %v1817_v30  ;;  %1214 = vmax.xlane.f32.xlu1 %v2623_v32 }
 0x43f   :  { %v1820_v37 = vpop.f32.mrf.mxu0 }
 0x440   :  { %v2627_v40 = vadd.f32 %v1819_v36, %v2612_v19 }
 0x441   :  { %v1821_v41 = vpop.f32.mrf.mxu0 }
 0x442   :  { %v1822_v42 = vadd.f32 %v1821_v41, %v1820_v37  ;;  %1216 = vmax.xlane.f32.xlu1 %v2627_v40 }
 0x443   :  { %v1823_v43 = vpop.f32.mrf.mxu0 }
 0x444   :  { %v2631_v44 = vadd.f32 %v1822_v42, %v2612_v19 }
 0x445   :  { %v1824_v45 = vpop.f32.mrf.mxu0 }
 0x446   :  { %v1825_v46 = vadd.f32 %v1824_v45, %v1823_v43  ;;  %1218 = vmax.xlane.f32.xlu0 %v2631_v44 }
 0x447   :  { %v1826_v47 = vpop.f32.mrf.mxu0 }
 0x448   :  { %v2635_v48 = vadd.f32 %v1825_v46, %v2612_v19 }
 0x449   :  { %v1827_v11 = vpop.f32.mrf.mxu0 }
 0x44a   :  { %v1828_v31 = vadd.f32 %v1827_v11, %v1826_v47  ;;  %1220 = vmax.xlane.f32.xlu1 %v2635_v48 }
 0x44b   :  { %v1829_v39 = vpop.f32.mrf.mxu0 }
 0x44c   :  { %v2639_v50 = vadd.f32 %v1828_v31, %v2612_v19 }
 0x44d   :  { %v1830_v51 = vpop.f32.mrf.mxu0 }
 0x44e   :  { %v1831_v53 = vadd.f32 %v1830_v51, %v1829_v39  ;;  %1222 = vmax.xlane.f32.xlu0 %v2639_v50 }
 0x44f   :  { %v1832_v52 = vpop.f32.mrf.mxu0 }
 0x450   :  { %v2643_v54 = vadd.f32 %v1831_v53, %v2612_v19 }
 0x451   :  { %v1833_v56 = vpop.f32.mrf.mxu0 }
 0x452   :  { %v1834_v24 = vadd.f32 %v1833_v56, %v1832_v52  ;;  %1224 = vmax.xlane.f32.xlu1 %v2643_v54 }
 0x453   :  { %v1835_v58 = vpop.f32.mrf.mxu0 }
 0x454   :  { %v2647_v59 = vadd.f32 %v1834_v24, %v2612_v19 }
 0x455   :  { %v1836_v60 = vpop.f32.mrf.mxu0 }
 0x456   :  { %v1837_v61 = vadd.f32 %v1836_v60, %v1835_v58  ;;  %1226 = vmax.xlane.f32.xlu0 %v2647_v59 }
 0x457   :  { %v1838_v62 = vpop.f32.mrf.mxu0 }
 0x458   :  { %v2651_v63 = vadd.f32 %v1837_v61, %v2612_v19 }
 0x459   :  { %v1839_v0 = vpop.f32.mrf.mxu0 }
 0x45a   :  { %v1840_v1 = vadd.f32 %v1839_v0, %v1838_v62  ;;  %1228 = vmax.xlane.f32.xlu1 %v2651_v63 }
 0x45b   :  { %v1841_v2 = vpop.f32.mrf.mxu0 }
 0x45c   :  { %v2655_v3 = vadd.f32 %v1840_v1, %v2612_v19 }
 0x45d   :  { %v1842_v4 = vpop.f32.mrf.mxu0 }
 0x45e   :  { %v1843_v5 = vadd.f32 %v1842_v4, %v1841_v2  ;;  %1230 = vmax.xlane.f32.xlu0 %v2655_v3 }
 0x45f   :  { %v1844_v6 = vpop.f32.mrf.mxu0 }
 0x460   :  { %v2659_v7 = vadd.f32 %v1843_v5, %v2612_v19 }
 0x461   :  { %v1845_v8 = vpop.f32.mrf.mxu0 }
 0x462   :  { %v1846_v9 = vadd.f32 %v1845_v8, %v1844_v6  ;;  %1232 = vmax.xlane.f32.xlu1 %v2659_v7 }
 0x463   :  { %v1847_v13 = vpop.f32.mrf.mxu0 }
 0x464   :  { %v2663_v34 = vadd.f32 %v1846_v9, %v2612_v19 }
 0x465   :  { %v1848_v35 = vpop.f32.mrf.mxu0 }
 0x466   :  { %v1849_v38 = vadd.f32 %v1848_v35, %v1847_v13  ;;  %1234 = vmax.xlane.f32.xlu0 %v2663_v34 }
 0x467   :  { %v1850_v49 = vpop.f32.mrf.mxu0 }
 0x468   :  { %v2667_v55 = vadd.f32 %v1849_v38, %v2612_v19 }
 0x469   :  { %v1851_v57 = vpop.f32.mrf.mxu0 }
 0x46a   :  { %v1852_v10 = vadd.f32 %v1851_v57, %v1850_v49  ;;  %1236 = vmax.xlane.f32.xlu1 %v2667_v55 }
 0x46b   :  { %v1853_v12 = vpop.f32.mrf.mxu0 }
 0x46c   :  { %v2671_v14 = vadd.f32 %v1852_v10, %v2612_v19 }
 0x46d   :  { %v1854_v15 = vpop.f32.mrf.mxu0 }
 0x46e   :  { %v1855_v16 = vadd.f32 %v1854_v15, %v1853_v12  ;;  %1238 = vmax.xlane.f32.xlu0 %v2671_v14 }
 0x46f   :  { %v1856_v17 = vpop.f32.mrf.mxu0 }
 0x470   :  { %v2675_v18 = vadd.f32 %v1855_v16, %v2612_v19 }
 0x471   :  { %v1857_v20 = vpop.f32.mrf.mxu0 }
 0x472   :  { %v1858_v21 = vadd.f32 %v1857_v20, %v1856_v17  ;;  %1240 = vmax.xlane.f32.xlu1 %v2675_v18 }
 0x473   :  { %v1859_v23 = vpop.f32.mrf.mxu0 }
 0x474   :  { %v2679_v25 = vadd.f32 %v1858_v21, %v2612_v19 }
 0x475   :  { %v1860_v26 = vpop.f32.mrf.mxu0 }
 0x476   :  { %v1861_v28 = vadd.f32 %v1860_v26, %v1859_v23  ;;  %1242 = vmax.xlane.f32.xlu0 %v2679_v25 }
 0x477   :  { %v1862_v29 = vpop.f32.mrf.mxu0 }
 0x478   :  { %v2683_v30 = vadd.f32 %v1861_v28, %v2612_v19 }
 0x479   :  { %v1863_v33 = vpop.f32.mrf.mxu0 }
 0x47a   :  { %v1864_v36 = vadd.f32 %v1863_v33, %v1862_v29  ;;  %1244 = vmax.xlane.f32.xlu1 %v2683_v30 }
 0x47b   :  { %v1865_v37 = vpop.f32.mrf.mxu0 }
 0x47c   :  { %v2687_v41 = vadd.f32 %v1864_v36, %v2612_v19 }
 0x47d   :  { %v1866_v42 = vpop.f32.mrf.mxu0 }
 0x47e   :  { %v1867_v43 = vadd.f32 %v1866_v42, %v1865_v37  ;;  %1246 = vmax.xlane.f32.xlu0 %v2687_v41 }
 0x47f   :  { %v1868_v45 = vpop.f32.mrf.mxu0 }
 0x480   :  { %v2691_v46 = vadd.f32 %v1867_v43, %v2612_v19 }
 0x481   :  { %v1869_v47 = vpop.f32.mrf.mxu0 }
 0x482   :  { %v1870_v11 = vadd.f32 %v1869_v47, %v1868_v45  ;;  %1248 = vmax.xlane.f32.xlu1 %v2691_v46 }
 0x483   :  { %v1871_v31 = vpop.f32.mrf.mxu0 }
 0x484   :  { %v2695_v39 = vadd.f32 %v1870_v11, %v2612_v19 }
 0x485   :  { %v1872_v51 = vpop.f32.mrf.mxu0 }
 0x486   :  { %v1873_v53 = vadd.f32 %v1872_v51, %v1871_v31  ;;  %1250 = vmax.xlane.f32.xlu0 %v2695_v39 }
 0x487   :  { %v1874_v52 = vpop.f32.mrf.mxu0 }
 0x488   :  { %v2699_v56 = vadd.f32 %v1873_v53, %v2612_v19 }
 0x489   :  { %v1875_v24 = vpop.f32.mrf.mxu0 }
 0x48a   :  { %v1876_v58 = vadd.f32 %v1875_v24, %v1874_v52  ;;  %1252 = vmax.xlane.f32.xlu1 %v2699_v56 }
 0x48b   :  { %v1877_v60 = vpop.f32.mrf.mxu0 }
 0x48c   :  { %v2703_v61 = vadd.f32 %v1876_v58, %v2612_v19 }
 0x48d   :  { %v1878_v62 = vpop.f32.mrf.mxu0 }
 0x48e   :  { %v1879_v0 = vadd.f32 %v1878_v62, %v1877_v60  ;;  %1254 = vmax.xlane.f32.xlu0 %v2703_v61 }
 0x48f   :  { %v1880_v1 = vpop.f32.mrf.mxu0 }
 0x490   :  { %v2707_v2 = vadd.f32 %v1879_v0, %v2612_v19 }
 0x491   :  { %v1881_v4 = vpop.f32.mrf.mxu0 }
 0x492   :  { %v1882_v5 = vadd.f32 %v1881_v4, %v1880_v1  ;;  %1256 = vmax.xlane.f32.xlu1 %v2707_v2 }
 0x493   :  { %v1883_v6 = vpop.f32.mrf.mxu0 }
 0x494   :  { %v2711_v8 = vadd.f32 %v1882_v5, %v2612_v19 }
 0x495   :  { %v1884_v9 = vpop.f32.mrf.mxu0 }
 0x496   :  { %v1885_v13 = vadd.f32 %v1884_v9, %v1883_v6  ;;  %1258 = vmax.xlane.f32.xlu0 %v2711_v8 }
 0x497   :  { %v1886_v35 = vpop.f32.mrf.mxu0 }
 0x498   :  { %v2715_v38 = vadd.f32 %v1885_v13, %v2612_v19 }
 0x499   :  { %v1887_v49 = vpop.f32.mrf.mxu0 }
 0x49a   :  { %v1888_v57 = vadd.f32 %v1887_v49, %v1886_v35  ;;  %1260 = vmax.xlane.f32.xlu1 %v2715_v38 }
 0x49b   :  { %v1889_v10 = vpop.f32.mrf.mxu0 }
 0x49c   :  { %v2719_v12 = vadd.f32 %v1888_v57, %v2612_v19 }
 0x49d   :  { %v1890_v15 = vpop.f32.mrf.mxu0 }
 0x49e   :  { %v1891_v16 = vadd.f32 %v1890_v15, %v1889_v10  ;;  %1262 = vmax.xlane.f32.xlu0 %v2719_v12 }
 0x49f   :  { %v1892_v17 = vpop.f32.mrf.mxu0 }
 0x4a0   :  { %v2723_v20 = vadd.f32 %v1891_v16, %v2612_v19 }
 0x4a1   :  { %v1893_v21 = vpop.f32.mrf.mxu0 }
 0x4a2   :  { %v1894_v23 = vadd.f32 %v1893_v21, %v1892_v17  ;;  %1264 = vmax.xlane.f32.xlu1 %v2723_v20 }
 0x4a3   :  { %v1895_v26 = vpop.f32.mrf.mxu0 }
 0x4a4   :  { %v2727_v28 = vadd.f32 %v1894_v23, %v2612_v19 }
 0x4a5   :  { %v1896_v29 = vpop.f32.mrf.mxu0 }
 0x4a6   :  { %v1897_v33 = vadd.f32 %v1896_v29, %v1895_v26  ;;  %1266 = vmax.xlane.f32.xlu0 %v2727_v28 }
 0x4a7   :  { %v1898_v36 = vpop.f32.mrf.mxu0 }
 0x4a8   :  { %v2731_v37 = vadd.f32 %v1897_v33, %v2612_v19 }
 0x4a9   :  { %v1899_v42 = vpop.f32.mrf.mxu0 }
 0x4aa   :  { %v1900_v43 = vadd.f32 %v1899_v42, %v1898_v36  ;;  %1268 = vmax.xlane.f32.xlu1 %v2731_v37 }
 0x4ab   :  { %v1901_v45 = vpop.f32.mrf.mxu0 }
 0x4ac   :  { %v2735_v47 = vadd.f32 %v1900_v43, %v2612_v19 }
 0x4ad   :  { %v1902_v11 = vpop.f32.mrf.mxu0 }
 0x4ae   :  { %v1903_v31 = vadd.f32 %v1902_v11, %v1901_v45  ;;  %1270 = vmax.xlane.f32.xlu0 %v2735_v47 }
 0x4b0   :  { %v2739_v51 = vadd.f32 %v1903_v31, %v2612_v19 }
 0x4b2   :  { %1272 = vmax.xlane.f32.xlu1 %v2739_v51 }
 0x4bf   :  { %v1211_v53 = vpop.xlane.xlu0 %1210 }
 0x4c0   :  { %v2743_v52 = vsub.f32 %v2615_v22, %v1211_v53 }
 0x4c2   :  { %v1306_v24 = vmul.f32 1.442695, %v2743_v52 }
 0x4c3   :  { %v1213_v58 = vpop.xlane.xlu0 %1212 }
 0x4c4   :  { %2080 = vpow2.f32 %v1306_v24  ;;  %v2747_v60 = vsub.f32 %v2619_v27, %v1213_v58 }
 0x4c6   :  { %v1308_v62 = vmul.f32 1.442695, %v2747_v60 }
 0x4c7   :  { %v1215_v0 = vpop.xlane.xlu1 %1214 }
 0x4c8   :  { %2082 = vpow2.f32 %v1308_v62  ;;  %v2751_v19 = vsub.f32 %v2623_v32, %v1215_v0 }
 0x4ca   :  { %v1310_v1 = vmul.f32 1.442695, %v2751_v19 }
 0x4cb   :  { %v1217_v4 = vpop.xlane.xlu1 %1216 }
 0x4cc   :  { %2084 = vpow2.f32 %v1310_v1  ;;  %v2755_v22 = vsub.f32 %v2627_v40, %v1217_v4 }
 0x4ce   :  { %v1312_v5 = vmul.f32 1.442695, %v2755_v22 }
 0x4cf   :  { %v1219_v6 = vpop.xlane.xlu0 %1218 }
 0x4d0   :  { %2086 = vpow2.f32 %v1312_v5  ;;  %v2759_v27 = vsub.f32 %v2631_v44, %v1219_v6 }
 0x4d1   :  { %v2081_v9 = vpop.eup %2080 }
 0x4d2   :  { %v1314_v13 = vmul.f32 1.442695, %v2759_v27  ;;  %1370 = vadd.xlane.f32.xlu0 %v2081_v9 }
 0x4d3   :  { %v1221_v32 = vpop.xlane.xlu1 %1220 }
 0x4d4   :  { %2088 = vpow2.f32 %v1314_v13  ;;  %v2763_v35 = vsub.f32 %v2635_v48, %v1221_v32 }
 0x4d5   :  { %v2083_v49 = vpop.eup %2082 }
 0x4d6   :  { %v1316_v40 = vmul.f32 1.442695, %v2763_v35  ;;  %1372 = vadd.xlane.f32.xlu1 %v2083_v49 }
 0x4d7   :  { %v1223_v57 = vpop.xlane.xlu0 %1222 }
 0x4d8   :  { %2090 = vpow2.f32 %v1316_v40  ;;  %v2767_v10 = vsub.f32 %v2639_v50, %v1223_v57 }
 0x4d9   :  { %v2085_v44 = vpop.eup %2084 }
 0x4da   :  { %v1318_v15 = vmul.f32 1.442695, %v2767_v10  ;;  %1374 = vadd.xlane.f32.xlu0 %v2085_v44 }
 0x4db   :  { %v1225_v16 = vpop.xlane.xlu1 %1224 }
 0x4dc   :  { %2092 = vpow2.f32 %v1318_v15  ;;  %v2771_v17 = vsub.f32 %v2643_v54, %v1225_v16 }
 0x4dd   :  { %v2087_v48 = vpop.eup %2086 }
 0x4de   :  { %v1320_v21 = vmul.f32 1.442695, %v2771_v17  ;;  %1376 = vadd.xlane.f32.xlu1 %v2087_v48 }
 0x4df   :  { %v1227_v23 = vpop.xlane.xlu0 %1226 }
 0x4e0   :  { %2094 = vpow2.f32 %v1320_v21  ;;  %v2775_v26 = vsub.f32 %v2647_v59, %v1227_v23 }
 0x4e1   :  { %v2089_v50 = vpop.eup %2088 }
 0x4e2   :  { %v1322_v29 = vmul.f32 1.442695, %v2775_v26  ;;  %1378 = vadd.xlane.f32.xlu0 %v2089_v50 }
 0x4e3   :  { %v1229_v33 = vpop.xlane.xlu1 %1228 }
 0x4e4   :  { %2096 = vpow2.f32 %v1322_v29  ;;  %v2779_v36 = vsub.f32 %v2651_v63, %v1229_v33 }
 0x4e5   :  { %v2091_v54 = vpop.eup %2090 }
 0x4e6   :  { %v1324_v42 = vmul.f32 1.442695, %v2779_v36  ;;  %1380 = vadd.xlane.f32.xlu1 %v2091_v54 }
 0x4e7   :  { %v1231_v43 = vpop.xlane.xlu0 %1230 }
 0x4e8   :  { %2098 = vpow2.f32 %v1324_v42  ;;  %v2783_v45 = vsub.f32 %v2655_v3, %v1231_v43 }
 0x4e9   :  { %v2093_v59 = vpop.eup %2092 }
 0x4ea   :  { %v1326_v11 = vmul.f32 1.442695, %v2783_v45  ;;  %1382 = vadd.xlane.f32.xlu0 %v2093_v59 }
 0x4eb   :  { %v1233_v31 = vpop.xlane.xlu1 %1232 }
 0x4ec   :  { %2100 = vpow2.f32 %v1326_v11  ;;  %v2787_v53 = vsub.f32 %v2659_v7, %v1233_v31 }
 0x4ed   :  { %v2095_v63 = vpop.eup %2094 }
 0x4ee   :  { %v1328_v24 = vmul.f32 1.442695, %v2787_v53  ;;  %1384 = vadd.xlane.f32.xlu1 %v2095_v63 }
 0x4ef   :  { %v1235_v58 = vpop.xlane.xlu0 %1234 }
 0x4f0   :  { %2102 = vpow2.f32 %v1328_v24  ;;  %v2791_v62 = vsub.f32 %v2663_v34, %v1235_v58 }
 0x4f1   :  { %v2097_v3 = vpop.eup %2096 }
 0x4f2   :  { %v1330_v0 = vmul.f32 1.442695, %v2791_v62  ;;  %1386 = vadd.xlane.f32.xlu0 %v2097_v3 }
 0x4f3   :  { %v1237_v1 = vpop.xlane.xlu1 %1236 }
 0x4f4   :  { %2104 = vpow2.f32 %v1330_v0  ;;  %v2795_v4 = vsub.f32 %v2667_v55, %v1237_v1 }
 0x4f5   :  { %v2099_v7 = vpop.eup %2098 }
 0x4f6   :  { %v1332_v5 = vmul.f32 1.442695, %v2795_v4  ;;  %1388 = vadd.xlane.f32.xlu1 %v2099_v7 }
 0x4f7   :  { %v1239_v6 = vpop.xlane.xlu0 %1238 }
 0x4f8   :  { %2106 = vpow2.f32 %v1332_v5  ;;  %v2799_v9 = vsub.f32 %v2671_v14, %v1239_v6 }
 0x4f9   :  { %v2101_v34 = vpop.eup %2100 }
 0x4fa   :  { %v1334_v13 = vmul.f32 1.442695, %v2799_v9  ;;  %1390 = vadd.xlane.f32.xlu0 %v2101_v34 }
 0x4fb   :  { %v1241_v32 = vpop.xlane.xlu1 %1240 }
 0x4fc   :  { %2108 = vpow2.f32 %v1334_v13  ;;  %v2803_v49 = vsub.f32 %v2675_v18, %v1241_v32 }
 0x4fd   :  { %v2103_v55 = vpop.eup %2102 }
 0x4fe   :  { %v1336_v40 = vmul.f32 1.442695, %v2803_v49  ;;  %1392 = vadd.xlane.f32.xlu1 %v2103_v55 }
 0x4ff   :  { %v1243_v57 = vpop.xlane.xlu0 %1242 }
 0x500   :  { %2110 = vpow2.f32 %v1336_v40  ;;  %v2807_v44 = vsub.f32 %v2679_v25, %v1243_v57 }
 0x501   :  { %v2105_v14 = vpop.eup %2104 }
 0x502   :  { %v1338_v15 = vmul.f32 1.442695, %v2807_v44  ;;  %1394 = vadd.xlane.f32.xlu0 %v2105_v14 }
 0x503   :  { %v1245_v16 = vpop.xlane.xlu1 %1244 }
 0x504   :  { %2112 = vpow2.f32 %v1338_v15  ;;  %v2811_v48 = vsub.f32 %v2683_v30, %v1245_v16 }
 0x505   :  { %v2107_v18 = vpop.eup %2106 }
 0x506   :  { %v1340_v21 = vmul.f32 1.442695, %v2811_v48  ;;  %1396 = vadd.xlane.f32.xlu1 %v2107_v18 }
 0x507   :  { %v1247_v23 = vpop.xlane.xlu0 %1246 }
 0x508   :  { %2114 = vpow2.f32 %v1340_v21  ;;  %v2815_v50 = vsub.f32 %v2687_v41, %v1247_v23 }
 0x509   :  { %v2109_v25 = vpop.eup %2108 }
 0x50a   :  { %v1342_v29 = vmul.f32 1.442695, %v2815_v50  ;;  %1398 = vadd.xlane.f32.xlu0 %v2109_v25 }
 0x50b   :  { %v1249_v33 = vpop.xlane.xlu1 %1248 }
 0x50c   :  { %2116 = vpow2.f32 %v1342_v29  ;;  %v2819_v54 = vsub.f32 %v2691_v46, %v1249_v33 }
 0x50d   :  { %v2111_v30 = vpop.eup %2110 }
 0x50e   :  { %v1344_v42 = vmul.f32 1.442695, %v2819_v54  ;;  %1400 = vadd.xlane.f32.xlu1 %v2111_v30 }
 0x50f   :  { %v1251_v43 = vpop.xlane.xlu0 %1250 }
 0x510   :  { %2118 = vpow2.f32 %v1344_v42  ;;  %v2823_v59 = vsub.f32 %v2695_v39, %v1251_v43 }
 0x511   :  { %v2113_v41 = vpop.eup %2112 }
 0x512   :  { %v1346_v11 = vmul.f32 1.442695, %v2823_v59  ;;  %1402 = vadd.xlane.f32.xlu0 %v2113_v41 }
 0x513   :  { %v1253_v31 = vpop.xlane.xlu1 %1252 }
 0x514   :  { %2120 = vpow2.f32 %v1346_v11  ;;  %v2827_v63 = vsub.f32 %v2699_v56, %v1253_v31 }
 0x515   :  { %v2115_v46 = vpop.eup %2114 }
 0x516   :  { %v1348_v24 = vmul.f32 1.442695, %v2827_v63  ;;  %1404 = vadd.xlane.f32.xlu1 %v2115_v46 }
 0x517   :  { %v1255_v58 = vpop.xlane.xlu0 %1254 }
 0x518   :  { %2122 = vpow2.f32 %v1348_v24  ;;  %v2831_v3 = vsub.f32 %v2703_v61, %v1255_v58 }
 0x519   :  { %v2117_v39 = vpop.eup %2116 }
 0x51a   :  { %v1350_v0 = vmul.f32 1.442695, %v2831_v3  ;;  %1406 = vadd.xlane.f32.xlu0 %v2117_v39 }
 0x51b   :  { %v1257_v1 = vpop.xlane.xlu1 %1256 }
 0x51c   :  { %2124 = vpow2.f32 %v1350_v0  ;;  %v2835_v7 = vsub.f32 %v2707_v2, %v1257_v1 }
 0x51d   :  { %v2119_v56 = vpop.eup %2118 }
 0x51e   :  { %v1352_v5 = vmul.f32 1.442695, %v2835_v7  ;;  %1408 = vadd.xlane.f32.xlu1 %v2119_v56 }
 0x51f   :  { %v1259_v6 = vpop.xlane.xlu0 %1258 }
 0x520   :  { %2126 = vpow2.f32 %v1352_v5  ;;  %v2839_v34 = vsub.f32 %v2711_v8, %v1259_v6 }
 0x521   :  { %v2121_v61 = vpop.eup %2120 }
 0x522   :  { %v1354_v13 = vmul.f32 1.442695, %v2839_v34  ;;  %1410 = vadd.xlane.f32.xlu0 %v2121_v61 }
 0x523   :  { %v1261_v32 = vpop.xlane.xlu1 %1260 }
 0x524   :  { %2128 = vpow2.f32 %v1354_v13  ;;  %v2843_v55 = vsub.f32 %v2715_v38, %v1261_v32 }
 0x525   :  { %v2123_v2 = vpop.eup %2122 }
 0x526   :  { %v1356_v40 = vmul.f32 1.442695, %v2843_v55  ;;  %1412 = vadd.xlane.f32.xlu1 %v2123_v2 }
 0x527   :  { %v1263_v57 = vpop.xlane.xlu0 %1262 }
 0x528   :  { %2130 = vpow2.f32 %v1356_v40  ;;  %v2847_v14 = vsub.f32 %v2719_v12, %v1263_v57 }
 0x529   :  { %v2125_v8 = vpop.eup %2124 }
 0x52a   :  { %v1358_v15 = vmul.f32 1.442695, %v2847_v14  ;;  %1414 = vadd.xlane.f32.xlu0 %v2125_v8 }
 0x52b   :  { %v1265_v16 = vpop.xlane.xlu1 %1264 }
 0x52c   :  { %2132 = vpow2.f32 %v1358_v15  ;;  %v2851_v18 = vsub.f32 %v2723_v20, %v1265_v16 }
 0x52d   :  { %v2127_v38 = vpop.eup %2126 }
 0x52e   :  { %v1360_v21 = vmul.f32 1.442695, %v2851_v18  ;;  %1416 = vadd.xlane.f32.xlu1 %v2127_v38 }
 0x52f   :  { %v1267_v23 = vpop.xlane.xlu0 %1266 }
 0x530   :  { %2134 = vpow2.f32 %v1360_v21  ;;  %v2855_v25 = vsub.f32 %v2727_v28, %v1267_v23 }
 0x531   :  { %v2129_v12 = vpop.eup %2128 }
 0x532   :  { %v1362_v29 = vmul.f32 1.442695, %v2855_v25  ;;  %1418 = vadd.xlane.f32.xlu0 %v2129_v12 }
 0x533   :  { %v1269_v33 = vpop.xlane.xlu1 %1268 }
 0x534   :  { %2136 = vpow2.f32 %v1362_v29  ;;  %v2859_v30 = vsub.f32 %v2731_v37, %v1269_v33 }
 0x535   :  { %v2131_v20 = vpop.eup %2130 }
 0x536   :  { %v1364_v42 = vmul.f32 1.442695, %v2859_v30  ;;  %1420 = vadd.xlane.f32.xlu1 %v2131_v20 }
 0x537   :  { %v1271_v43 = vpop.xlane.xlu0 %1270 }
 0x538   :  { %2138 = vpow2.f32 %v1364_v42  ;;  %v2863_v41 = vsub.f32 %v2735_v47, %v1271_v43 }
 0x539   :  { %v2133_v28 = vpop.eup %2132 }
 0x53a   :  { %v1366_v11 = vmul.f32 1.442695, %v2863_v41  ;;  %1422 = vadd.xlane.f32.xlu0 %v2133_v28 }
 0x53b   :  { %v1273_v31 = vpop.xlane.xlu1 %1272 }
 0x53c   :  { %2140 = vpow2.f32 %v1366_v11  ;;  %v2867_v46 = vsub.f32 %v2739_v51, %v1273_v31 }
 0x53d   :  { %v2135_v37 = vpop.eup %2134 }
 0x53e   :  { %v1368_v24 = vmul.f32 1.442695, %v2867_v46  ;;  %1424 = vadd.xlane.f32.xlu1 %v2135_v37 }
 0x540   :  { %2142 = vpow2.f32 %v1368_v24 }
 0x541   :  { %v2137_v58 = vpop.eup %2136 }
 0x542   :  { %1426 = vadd.xlane.f32.xlu0 %v2137_v58 }
 0x545   :  { %v2139_v39 = vpop.eup %2138 }
 0x546   :  { %1428 = vadd.xlane.f32.xlu1 %v2139_v39 }
 0x549   :  { %v2141_v47 = vpop.eup %2140 }
 0x54a   :  { %1430 = vadd.xlane.f32.xlu0 %v2141_v47 }
 0x54d   :  { %v2143_v0 = vpop.eup %2142 }
 0x54e   :  { %1432 = vadd.xlane.f32.xlu1 %v2143_v0 }
 0x55b   :  { %v1371_v1 = vpop.xlane.xlu0 %1370 }
 0x55c   :  { %2144 = vlog2.f32 %v1371_v1 }
 0x55f   :  { %v1373_v56 = vpop.xlane.xlu1 %1372 }
 0x560   :  { %2146 = vlog2.f32 %v1373_v56 }
 0x563   :  { %v1375_v5 = vpop.xlane.xlu0 %1374 }
 0x564   :  { %2148 = vlog2.f32 %v1375_v5 }
 0x567   :  { %v1377_v51 = vpop.xlane.xlu1 %1376 }
 0x568   :  { %2150 = vlog2.f32 %v1377_v51 }
 0x569   :  { %v2145_v6 = vpop.eup %2144 }
 0x56a   :  { %v1435_v61 = vmul.f32 0.6931472, %v2145_v6 }
 0x56b   :  { %v1379_v13 = vpop.xlane.xlu0 %1378 }
 0x56c   :  { %v1498_v32 = vsub.f32 %v2743_v52, %v1435_v61  ;;  %2152 = vlog2.f32 %v1379_v13 }
 0x56d   :  { %v2147_v2 = vpop.eup %2146 }
 0x56e   :  { %1530 = vst [vmem:[%s3004_s6] sm:$0xff] %v1498_v32  ;;  %v1437_v40 = vmul.f32 0.6931472, %v2147_v2 }
 0x56f   :  { %v1381_v57 = vpop.xlane.xlu1 %1380 }
 0x570   :  { %v1499_v8 = vsub.f32 %v2747_v60, %v1437_v40  ;;  %2154 = vlog2.f32 %v1381_v57 }
 0x571   :  { %v2149_v15 = vpop.eup %2148 }
 0x572   :  { %1531 = vst [vmem:[%s3004_s6 + $0x8] sm:$0xff] %v1499_v8  ;;  %v1439_v16 = vmul.f32 0.6931472, %v2149_v15 }
 0x573   :  { %v1383_v38 = vpop.xlane.xlu0 %1382 }
 0x574   :  { %v1500_v52 = vsub.f32 %v2751_v19, %v1439_v16  ;;  %2156 = vlog2.f32 %v1383_v38 }
 0x575   :  { %v2151_v21 = vpop.eup %2150 }
 0x576   :  { %1532 = vst [vmem:[%s3004_s6 + $0x10] sm:$0xff] %v1500_v52  ;;  %v1441_v23 = vmul.f32 0.6931472, %v2151_v21 }
 0x577   :  { %v1385_v12 = vpop.xlane.xlu1 %1384 }
 0x578   :  { %v1501_v60 = vsub.f32 %v2755_v22, %v1441_v23  ;;  %2158 = vlog2.f32 %v1385_v12 }
 0x579   :  { %v2153_v29 = vpop.eup %2152 }
 0x57a   :  { %1533 = vst [vmem:[%s3004_s6 + $0x18] sm:$0xff] %v1501_v60  ;;  %v1443_v33 = vmul.f32 0.6931472, %v2153_v29 }
 0x57b   :  { %v1387_v20 = vpop.xlane.xlu0 %1386 }
 0x57c   :  { %v1502_v19 = vsub.f32 %v2759_v27, %v1443_v33  ;;  %2160 = vlog2.f32 %v1387_v20 }
 0x57d   :  { %v2155_v42 = vpop.eup %2154 }
 0x57e   :  { %1534 = vst [vmem:[%s3004_s6 + $0x20] sm:$0xff] %v1502_v19  ;;  %v1445_v43 = vmul.f32 0.6931472, %v2155_v42 }
 0x57f   :  { %v1389_v28 = vpop.xlane.xlu1 %1388 }
 0x580   :  { %v1503_v22 = vsub.f32 %v2763_v35, %v1445_v43  ;;  %2162 = vlog2.f32 %v1389_v28 }
 0x581   :  { %v2157_v11 = vpop.eup %2156 }
 0x582   :  { %1535 = vst [vmem:[%s3004_s6 + $0x28] sm:$0xff] %v1503_v22  ;;  %v1447_v31 = vmul.f32 0.6931472, %v2157_v11 }
 0x583   :  { %v1391_v37 = vpop.xlane.xlu0 %1390 }
 0x584   :  { %v1504_v27 = vsub.f32 %v2767_v10, %v1447_v31  ;;  %2164 = vlog2.f32 %v1391_v37 }
 0x585   :  { %v2159_v24 = vpop.eup %2158 }
 0x586   :  { %1536 = vst [vmem:[%s3004_s6 + $0x30] sm:$0xff] %v1504_v27  ;;  %v1449_v58 = vmul.f32 0.6931472, %v2159_v24 }
 0x587   :  { %v1393_v39 = vpop.xlane.xlu1 %1392 }
 0x588   :  { %v1505_v35 = vsub.f32 %v2771_v17, %v1449_v58  ;;  %2166 = vlog2.f32 %v1393_v39 }
 0x589   :  { %v2161_v47 = vpop.eup %2160 }
 0x58a   :  { %1537 = vst [vmem:[%s3004_s6 + $0x38] sm:$0xff] %v1505_v35  ;;  %v1451_v0 = vmul.f32 0.6931472, %v2161_v47 }
 0x58b   :  { %v1395_v1 = vpop.xlane.xlu0 %1394 }
 0x58c   :  { %v1506_v10 = vsub.f32 %v2775_v26, %v1451_v0  ;;  %2168 = vlog2.f32 %v1395_v1 }
 0x58d   :  { %v2163_v56 = vpop.eup %2162 }
 0x58e   :  { %1538 = vst [vmem:[%s3004_s6 + $0x40] sm:$0xff] %v1506_v10  ;;  %v1453_v5 = vmul.f32 0.6931472, %v2163_v56 }
 0x58f   :  { %v1397_v51 = vpop.xlane.xlu1 %1396 }
 0x590   :  { %v1507_v17 = vsub.f32 %v2779_v36, %v1453_v5  ;;  %2170 = vlog2.f32 %v1397_v51 }
 0x591   :  { %v2165_v6 = vpop.eup %2164 }
 0x592   :  { %1539 = vst [vmem:[%s3004_s6 + $0x48] sm:$0xff] %v1507_v17  ;;  %v1455_v61 = vmul.f32 0.6931472, %v2165_v6 }
 0x593   :  { %v1399_v13 = vpop.xlane.xlu0 %1398 }
 0x594   :  { %v1508_v26 = vsub.f32 %v2783_v45, %v1455_v61  ;;  %2172 = vlog2.f32 %v1399_v13 }
 0x595   :  { %v2167_v32 = vpop.eup %2166 }
 0x596   :  { %1540 = vst [vmem:[%s3004_s6 + $0x50] sm:$0xff] %v1508_v26  ;;  %v1457_v2 = vmul.f32 0.6931472, %v2167_v32 }
 0x597   :  { %v1401_v40 = vpop.xlane.xlu1 %1400 }
 0x598   :  { %v1509_v36 = vsub.f32 %v2787_v53, %v1457_v2  ;;  %2174 = vlog2.f32 %v1401_v40 }
 0x599   :  { %v2169_v57 = vpop.eup %2168 }
 0x59a   :  { %1541 = vst [vmem:[%s3004_s6 + $0x58] sm:$0xff] %v1509_v36  ;;  %v1459_v8 = vmul.f32 0.6931472, %v2169_v57 }
 0x59b   :  { %v1403_v15 = vpop.xlane.xlu0 %1402 }
 0x59c   :  { %v1510_v45 = vsub.f32 %v2791_v62, %v1459_v8  ;;  %2176 = vlog2.f32 %v1403_v15 }
 0x59d   :  { %v2171_v16 = vpop.eup %2170 }
 0x59e   :  { %1542 = vst [vmem:[%s3004_s6 + $0x60] sm:$0xff] %v1510_v45  ;;  %v1461_v38 = vmul.f32 0.6931472, %v2171_v16 }
 0x59f   :  { %v1405_v52 = vpop.xlane.xlu1 %1404 }
 0x5a0   :  { %v1511_v53 = vsub.f32 %v2795_v4, %v1461_v38  ;;  %2178 = vlog2.f32 %v1405_v52 }
 0x5a1   :  { %v2173_v21 = vpop.eup %2172 }
 0x5a2   :  { %1543 = vst [vmem:[%s3004_s6 + $0x68] sm:$0xff] %v1511_v53  ;;  %v1463_v23 = vmul.f32 0.6931472, %v2173_v21 }
 0x5a3   :  { %v1407_v12 = vpop.xlane.xlu0 %1406 }
 0x5a4   :  { %v1512_v62 = vsub.f32 %v2799_v9, %v1463_v23  ;;  %2180 = vlog2.f32 %v1407_v12 }
 0x5a5   :  { %v2175_v60 = vpop.eup %2174 }
 0x5a6   :  { %1544 = vst [vmem:[%s3004_s6 + $0x70] sm:$0xff] %v1512_v62  ;;  %v1465_v29 = vmul.f32 0.6931472, %v2175_v60 }
 0x5a7   :  { %v1409_v33 = vpop.xlane.xlu1 %1408 }
 0x5a8   :  { %v1513_v4 = vsub.f32 %v2803_v49, %v1465_v29  ;;  %2182 = vlog2.f32 %v1409_v33 }
 0x5a9   :  { %v2177_v20 = vpop.eup %2176 }
 0x5aa   :  { %1545 = vst [vmem:[%s3004_s6 + $0x78] sm:$0xff] %v1513_v4  ;;  %v1467_v19 = vmul.f32 0.6931472, %v2177_v20 }
 0x5ab   :  { %v1411_v42 = vpop.xlane.xlu0 %1410 }
 0x5ac   :  { %v1514_v9 = vsub.f32 %v2807_v44, %v1467_v19  ;;  %2184 = vlog2.f32 %v1411_v42 }
 0x5ad   :  { %v2179_v43 = vpop.eup %2178 }
 0x5ae   :  { %1546 = vst [vmem:[%s3004_s6 + $0x80] sm:$0xff] %v1514_v9  ;;  %v1469_v28 = vmul.f32 0.6931472, %v2179_v43 }
 0x5af   :  { %v1413_v22 = vpop.xlane.xlu1 %1412 }
 0x5b0   :  { %v1515_v49 = vsub.f32 %v2811_v48, %v1469_v28  ;;  %2186 = vlog2.f32 %v1413_v22 }
 0x5b1   :  { %v2181_v11 = vpop.eup %2180 }
 0x5b2   :  { %1547 = vst [vmem:[%s3004_s6 + $0x88] sm:$0xff] %v1515_v49  ;;  %v1471_v31 = vmul.f32 0.6931472, %v2181_v11 }
 0x5b3   :  { %v1415_v37 = vpop.xlane.xlu0 %1414 }
 0x5b4   :  { %v1516_v44 = vsub.f32 %v2815_v50, %v1471_v31  ;;  %2188 = vlog2.f32 %v1415_v37 }
 0x5b5   :  { %v2183_v27 = vpop.eup %2182 }
 0x5b6   :  { %1548 = vst [vmem:[%s3004_s6 + $0x90] sm:$0xff] %v1516_v44  ;;  %v1473_v24 = vmul.f32 0.6931472, %v2183_v27 }
 0x5b7   :  { %v1417_v58 = vpop.xlane.xlu1 %1416 }
 0x5b8   :  { %v1517_v48 = vsub.f32 %v2819_v54, %v1473_v24  ;;  %2190 = vlog2.f32 %v1417_v58 }
 0x5b9   :  { %v2185_v39 = vpop.eup %2184 }
 0x5ba   :  { %1549 = vst [vmem:[%s3004_s6 + $0x98] sm:$0xff] %v1517_v48  ;;  %v1475_v35 = vmul.f32 0.6931472, %v2185_v39 }
 0x5bb   :  { %v1419_v47 = vpop.xlane.xlu0 %1418 }
 0x5bc   :  { %v1518_v50 = vsub.f32 %v2823_v59, %v1475_v35  ;;  %2192 = vlog2.f32 %v1419_v47 }
 0x5bd   :  { %v2187_v0 = vpop.eup %2186 }
 0x5be   :  { %1550 = vst [vmem:[%s3004_s6 + $0xa0] sm:$0xff] %v1518_v50  ;;  %v1477_v1 = vmul.f32 0.6931472, %v2187_v0 }
 0x5bf   :  { %v1421_v10 = vpop.xlane.xlu1 %1420 }
 0x5c0   :  { %v1519_v54 = vsub.f32 %v2827_v63, %v1477_v1  ;;  %2194 = vlog2.f32 %v1421_v10 }
 0x5c1   :  { %v2189_v56 = vpop.eup %2188 }
 0x5c2   :  { %1551 = vst [vmem:[%s3004_s6 + $0xa8] sm:$0xff] %v1519_v54  ;;  %v1479_v5 = vmul.f32 0.6931472, %v2189_v56 }
 0x5c3   :  { %v1423_v51 = vpop.xlane.xlu0 %1422 }
 0x5c4   :  { %v1520_v59 = vsub.f32 %v2831_v3, %v1479_v5  ;;  %2196 = vlog2.f32 %v1423_v51 }
 0x5c5   :  { %v2191_v17 = vpop.eup %2190 }
 0x5c6   :  { %1552 = vst [vmem:[%s3004_s6 + $0xb0] sm:$0xff] %v1520_v59  ;;  %v1481_v6 = vmul.f32 0.6931472, %v2191_v17 }
 0x5c7   :  { %v1425_v61 = vpop.xlane.xlu1 %1424 }
 0x5c8   :  { %v1521_v63 = vsub.f32 %v2835_v7, %v1481_v6  ;;  %2198 = vlog2.f32 %v1425_v61 }
 0x5c9   :  { %v2193_v13 = vpop.eup %2192 }
 0x5ca   :  { %1553 = vst [vmem:[%s3004_s6 + $0xb8] sm:$0xff] %v1521_v63  ;;  %v1483_v26 = vmul.f32 0.6931472, %v2193_v13 }
 0x5cb   :  { %v1427_v32 = vpop.xlane.xlu0 %1426 }
 0x5cc   :  { %v1522_v3 = vsub.f32 %v2839_v34, %v1483_v26  ;;  %2200 = vlog2.f32 %v1427_v32 }
 0x5cd   :  { %v2195_v2 = vpop.eup %2194 }
 0x5ce   :  { %1554 = vst [vmem:[%s3004_s6 + $0xc0] sm:$0xff] %v1522_v3  ;;  %v1485_v40 = vmul.f32 0.6931472, %v2195_v2 }
 0x5cf   :  { %v1429_v36 = vpop.xlane.xlu1 %1428 }
 0x5d0   :  { %v1523_v7 = vsub.f32 %v2843_v55, %v1485_v40  ;;  %2202 = vlog2.f32 %v1429_v36 }
 0x5d1   :  { %v2197_v57 = vpop.eup %2196 }
 0x5d2   :  { %1555 = vst [vmem:[%s3004_s6 + $0xc8] sm:$0xff] %v1523_v7  ;;  %v1487_v8 = vmul.f32 0.6931472, %v2197_v57 }
 0x5d3   :  { %v1431_v15 = vpop.xlane.xlu0 %1430 }
 0x5d4   :  { %v1524_v34 = vsub.f32 %v2847_v14, %v1487_v8  ;;  %2204 = vlog2.f32 %v1431_v15 }
 0x5d5   :  { %v2199_v45 = vpop.eup %2198 }
 0x5d6   :  { %1556 = vst [vmem:[%s3004_s6 + $0xd0] sm:$0xff] %v1524_v34  ;;  %v1489_v16 = vmul.f32 0.6931472, %v2199_v45 }
 0x5d7   :  { %v1433_v38 = vpop.xlane.xlu1 %1432 }
 0x5d8   :  { %v1525_v55 = vsub.f32 %v2851_v18, %v1489_v16  ;;  %2206 = vlog2.f32 %v1433_v38 }
 0x5d9   :  { %v2201_v52 = vpop.eup %2200 }
 0x5da   :  { %1557 = vst [vmem:[%s3004_s6 + $0xd8] sm:$0xff] %v1525_v55  ;;  %v1491_v53 = vmul.f32 0.6931472, %v2201_v52 }
 0x5dc   :  { %v1526_v21 = vsub.f32 %v2855_v25, %v1491_v53 }
 0x5dd   :  { %v2203_v14 = vpop.eup %2202 }
 0x5de   :  { %1558 = vst [vmem:[%s3004_s6 + $0xe0] sm:$0xff] %v1526_v21  ;;  %v1493_v23 = vmul.f32 0.6931472, %v2203_v14 }
 0x5e0   :  { %v1527_v12 = vsub.f32 %v2859_v30, %v1493_v23 }
 0x5e1   :  { %v2205_v62 = vpop.eup %2204 }
 0x5e2   :  { %1559 = vst [vmem:[%s3004_s6 + $0xe8] sm:$0xff] %v1527_v12  ;;  %v1495_v18 = vmul.f32 0.6931472, %v2205_v62 }
 0x5e4   :  { %v1528_v60 = vsub.f32 %v2863_v41, %v1495_v18 }
 0x5e5   :  { %v2207_v29 = vpop.eup %2206 }
 0x5e6   :  { %1560 = vst [vmem:[%s3004_s6 + $0xf0] sm:$0xff] %v1528_v60  ;;  %v1497_v25 = vmul.f32 0.6931472, %v2207_v29 }
 0x5e8   :  { %v1529_v33 = vsub.f32 %v2867_v46, %v1497_v25 }
 0x5ea   :  { %1561 = vst [vmem:[%s3004_s6 + $0xf8] sm:$0xff] %v1529_v33 }

</bundles_post_ra>
